<compile_context>
chip_gen: v6e
topology: v6e:2x2x1
jax: 0.10.0
libtpu: 0.0.40
codegen_flags: <defaults>
</compile_context>

<pallas_src>
import functools

import jax
import jax.numpy as jnp
from jax.experimental import pallas as pl
from jax.experimental.pallas import tpu as pltpu

_LANE = 128
_SUBLANE = 8


def _round_up(x, m):
    return (x + m - 1) // m * m


def _lstm_recurrence_kernel(xproj_ref, whh_ref, out_ref, h_sc, c_sc, *,
                            t_blk, hp, seq_len, masked, unroll):
    """One (batch_block, time_block) grid step of the recurrence.

    xproj_ref: (t_blk, B_BLK, 4*hp) bf16  precomputed x @ W_ih^T + bias (padded)
    whh_ref:   (hp, 4*hp)           bf16  W_hh^T, gate-blocked, zero padded (resident)
    out_ref:   (B_BLK, hp)          f32   hn[-1] for this batch block
    h_sc/c_sc: (B_BLK, hp)          f32   recurrent carry across time blocks
    """
    tb = pl.program_id(1)  # time-block index (serial "arbitrary" axis)

    # h0 = c0 = 0 (PyTorch default when no initial state is given).
    @pl.when(tb == 0)
    def _():
        h_sc[...] = jnp.zeros_like(h_sc)
        c_sc[...] = jnp.zeros_like(c_sc)

    def step(t, carry):
        h, c = carry
        xt = xproj_ref[t]                    # (B_BLK, 4*hp) bf16
        h_b = h.astype(jnp.bfloat16)         # MXU-native operand; carry stays f32

        def gate_pre(k):
            # Per-gate (b_blk,128)x(128,128) matmul, consumed immediately:
            # keeps live vregs ~b_blk/8 instead of ~b_blk/2 for the full
            # (b_blk, 512) gates tensor.  bf16 slice is upcast right after load.
            return (xt[:, k * hp:(k + 1) * hp].astype(jnp.float32)
                    + jnp.dot(h_b, whh_ref[:, k * hp:(k + 1) * hp],
                              preferred_element_type=jnp.float32))

        i_g = jax.nn.sigmoid(gate_pre(0))
        f_g = jax.nn.sigmoid(gate_pre(1))
        g_g = jnp.tanh(gate_pre(2))
        o_g = jax.nn.sigmoid(gate_pre(3))
        c_new = f_g * c + i_g * g_g
        h_new = o_g * jnp.tanh(c_new)
        if masked:  # static flag; only traced when T was padded up to T_pad
            valid = (tb * t_blk + t) < seq_len
            h_new = jnp.where(valid, h_new, h)
            c_new = jnp.where(valid, c_new, c)
        return h_new, c_new

    h, c = jax.lax.fori_loop(0, t_blk, step, (h_sc[...], c_sc[...]),
                             unroll=unroll)
    h_sc[...] = h
    c_sc[...] = c

    @pl.when(tb == pl.num_programs(1) - 1)
    def _():
        out_ref[...] = h.astype(out_ref.dtype)


@functools.partial(jax.jit, static_argnames=("t_blk", "b_blk", "unroll"))
def lstm_feature_extractor(x, w_ih, w_hh, b_ih, b_hh, *,
                           t_blk=None, b_blk=None, unroll=8):
    """Returns hn[-1] of a single-layer batch_first LSTM.

    x:     (B, T, D) f32   (PyTorch batch_first layout)
    w_ih:  (4H, D)   f32   (PyTorch weight_ih_l0)
    w_hh:  (4H, H)   f32   (PyTorch weight_hh_l0)
    b_ih, b_hh: (4H,) f32
    returns (B, H) f32
    """
    B, T, D = x.shape
    H = w_hh.shape[1]

    Hp = _round_up(H, _LANE)          # lane-aligned hidden width per gate

    # ---- block-size heuristics (sweep / override per chip) -------------------
    # Batch block: as large as possible (up to 64) so the latency-bound serial
    # step amortizes over many rows.  NOTE(v7x): with large B, prefer a b_blk
    # that yields num_b as a multiple of 2 so both TensorCores engage.
    if b_blk is None:
        b_blk = min(64, _round_up(B, _SUBLANE))
    assert b_blk % _SUBLANE == 0, "b_blk must be a multiple of 8 (sublane)"
    Bp = _round_up(_round_up(B, _SUBLANE), b_blk)

    # Time block: fewer grid steps on the serial axis, but avoid excessive
    # masked-tail padding (waste capped at ~T/8 or 7 steps).
    if t_blk is None:
        t_blk = 8
        for cand in (64, 32, 16, 8):
            if _round_up(T, cand) - T <= max(T // 8, 7):
                t_blk = cand
                break
    T_pad = _round_up(T, t_blk)
    masked = (T_pad != T)
    unroll_amt = max(1, min(int(unroll), t_blk))   # partial unroll of the time loop

    # Gate-blocked, zero-padded, pre-transposed weights:
    #   gate k occupies columns [k*Hp, k*Hp + H); padding is exactly neutral.
    x32 = x.astype(jnp.float32)
    w_ih = w_ih.astype(jnp.float32)
    w_hh = w_hh.astype(jnp.float32)
    b_sum = (b_ih + b_hh).astype(jnp.float32)

    wih_p = jnp.zeros((D, 4 * Hp), jnp.float32)
    whh_p = jnp.zeros((Hp, 4 * Hp), jnp.float32)
    b_p = jnp.zeros((4 * Hp,), jnp.float32)
    for k in range(4):
        wih_p = wih_p.at[:, k * Hp:k * Hp + H].set(w_ih[k * H:(k + 1) * H, :].T)
        whh_p = whh_p.at[:H, k * Hp:k * Hp + H].set(w_hh[k * H:(k + 1) * H, :].T)
        b_p = b_p.at[k * Hp:k * Hp + H].set(b_sum[k * H:(k + 1) * H])

    # Hoisted input projection: one large MXU matmul over all (T*B) rows with
    # the bias folded in, emitted directly in time-major layout, then cast to
    # bf16 to halve the dominant HBM stream and the per-block VMEM buffers.
    xproj = jnp.einsum("btd,dg->tbg", x32, wih_p) + b_p        # (T, B, 4*Hp) f32
    xproj = jnp.pad(xproj, ((0, T_pad - T), (0, Bp - B), (0, 0)))
    xproj = xproj.astype(jnp.bfloat16)

    whh_bf = whh_p.astype(jnp.bfloat16)   # bf16 MXU operand; f32 accumulate in-kernel

    num_b = Bp // b_blk
    num_t = T_pad // t_blk

    kernel = functools.partial(_lstm_recurrence_kernel, t_blk=t_blk, hp=Hp,
                               seq_len=T, masked=masked, unroll=unroll_amt)

    # Explicit VMEM budget (v7x: 64 MiB physical / 32 MiB scoped default).
    blk_bytes = (2 * t_blk * b_blk * 4 * Hp * 2      # x_proj double-buffer (bf16)
                 + Hp * 4 * Hp * 2                   # resident W_hh^T (bf16)
                 + 4 * b_blk * Hp * 4)               # out block (x2) + h/c scratch (f32)
    vmem_limit = None
    if blk_bytes > 24 * 1024 * 1024:
        vmem_limit = min(blk_bytes + (16 << 20), 100 << 20)

    out_p = pl.pallas_call(
        kernel,
        out_shape=jax.ShapeDtypeStruct((Bp, Hp), jnp.float32),
        grid_spec=pltpu.PrefetchScalarGridSpec(
            num_scalar_prefetch=0,
            grid=(num_b, num_t),
            in_specs=[
                # (T_BLK, B_BLK, 4Hp) slab of the precomputed x projection (bf16).
                pl.BlockSpec((t_blk, b_blk, 4 * Hp), lambda b, t: (t, b, 0)),
                # W_hh^T stays resident in VMEM across the whole grid.
                pl.BlockSpec((Hp, 4 * Hp), lambda b, t: (0, 0)),
            ],
            out_specs=pl.BlockSpec((b_blk, Hp), lambda b, t: (b, 0)),
            scratch_shapes=[
                pltpu.VMEM((b_blk, Hp), jnp.float32),   # h carry
                pltpu.VMEM((b_blk, Hp), jnp.float32),   # c carry
            ],
        ),
        compiler_params=pltpu.CompilerParams(
            # batch blocks are independent (2-TC split on v7x); time is serial.
            dimension_semantics=("parallel", "arbitrary"),
            vmem_limit_bytes=vmem_limit,
        ),
    )(xproj, whh_bf)

    return out_p[:B, :H]


def _lstm_reference(x, w_ih, w_hh, b_ih, b_hh):
    """Pure-JAX f32 reference (lax.scan) with identical semantics."""
    B, T, D = x.shape
    H = w_hh.shape[1]
    bias = b_ih + b_hh

    def step(carry, x_t):
        h, c = carry
        gates = x_t @ w_ih.T + h @ w_hh.T + bias
        i_g = jax.nn.sigmoid(gates[:, 0 * H:1 * H])
        f_g = jax.nn.sigmoid(gates[:, 1 * H:2 * H])
        g_g = jnp.tanh(gates[:, 2 * H:3 * H])
        o_g = jax.nn.sigmoid(gates[:, 3 * H:4 * H])
        c_new = f_g * c + i_g * g_g
        h_new = o_g * jnp.tanh(c_new)
        return (h_new, c_new), None

    h0 = jnp.zeros((B, H), jnp.float32)
    c0 = jnp.zeros((B, H), jnp.float32)
    (h_final, _), _ = jax.lax.scan(step, (h0, c0), jnp.transpose(x, (1, 0, 2)))
    return h_final


if __name__ == "__main__":
    # Small shapes consistent with the module (input_dim=300, hidden_dim=64).
    B, T, D, H = 4, 8, 300, 64

    key = jax.random.PRNGKey(0)
    kx, k1, k2, k3, k4 = jax.random.split(key, 5)

    # Deterministic init mimicking PyTorch's U(-1/sqrt(H), 1/sqrt(H)).
    bound = 1.0 / jnp.sqrt(jnp.float32(H))
    x = jax.random.normal(kx, (B, T, D), dtype=jnp.float32)
    w_ih = jax.random.uniform(k1, (4 * H, D), jnp.float32, -bound, bound)
    w_hh = jax.random.uniform(k2, (4 * H, H), jnp.float32, -bound, bound)
    b_ih = jax.random.uniform(k3, (4 * H,), jnp.float32, -bound, bound)
    b_hh = jax.random.uniform(k4, (4 * H,), jnp.float32, -bound, bound)

    out = lstm_feature_extractor(x, w_ih, w_hh, b_ih, b_hh)
    out = jax.block_until_ready(out)

    ref = _lstm_reference(x, w_ih, w_hh, b_ih, b_hh)
    assert out.shape == (B, H)
    # Tolerance relaxed vs the f32 reference: x_proj and the recurrent MXU
    # operands are bf16 (accumulation and h/c carries remain f32).
    assert jnp.allclose(out, ref, atol=3e-2, rtol=3e-2), "mismatch vs reference"

    # NOTE: nn.LSTM's dropout=0.2 with num_layers=1 is a no-op in PyTorch
    # (dropout applies only between layers), so it is intentionally omitted.
    print("KERNEL_OK")
</pallas_src>

<mosaic_0001>
module attributes {stable_mosaic.version = 11 : i64} {
  func.func @_lstm_recurrence_kernel(%arg0: i32, %arg1: i32, %arg2: memref<8x8x512xbf16, #tpu.memory_space<vmem>>, %arg3: memref<128x512xbf16, #tpu.memory_space<vmem>>, %arg4: memref<8x128xf32, #tpu.memory_space<vmem>>, %arg5: memref<8x128xf32, #tpu.memory_space<vmem>>, %arg6: memref<8x128xf32, #tpu.memory_space<vmem>>) attributes {dimension_semantics = [#tpu.dimension_semantics<parallel>, #tpu.dimension_semantics<arbitrary>], iteration_bounds = array<i64: 1, 1>, scalar_prefetch = 0 : i64, scratch_operands = 2 : i64, tpu.core_type = #tpu.core_type<tc>, window_params = [{transform_indices = @transform_0, window_bounds = array<i64: 8, 8, 512>}, {pipeline_mode = #tpu.pipeline_mode<synchronous>, transform_indices = @transform_1, window_bounds = array<i64: 128, 512>}, {transform_indices = @transform_2, window_bounds = array<i64: 8, 128>}]} {
    %c0_i32 = arith.constant 0 : i32
    %0 = arith.cmpi eq, %arg1, %c0_i32 : i32
    %1 = arith.extui %0 : i1 to i32
    %c0_i32_0 = arith.constant 0 : i32
    %2 = arith.cmpi ne, %1, %c0_i32_0 : i32
    scf.if %2 {
      %cst_143 = arith.constant 0.000000e+00 : f32
      %370 = vector.broadcast %cst_143 : f32 to vector<8x128xf32>
      %c0_144 = arith.constant 0 : index
      %c0_145 = arith.constant 0 : index
      %371 = vector.load %arg5[%c0_144, %c0_145] : memref<8x128xf32, #tpu.memory_space<vmem>>, vector<8x128xf32>
      tpu.vector_store %arg5[%c0_144, %c0_145], %370 {strides = array<i32>} : memref<8x128xf32, #tpu.memory_space<vmem>>, vector<8x128xf32>,
      %cst_146 = arith.constant 0.000000e+00 : f32
      %372 = vector.broadcast %cst_146 : f32 to vector<8x128xf32>
      %c0_147 = arith.constant 0 : index
      %c0_148 = arith.constant 0 : index
      %373 = vector.load %arg6[%c0_147, %c0_148] : memref<8x128xf32, #tpu.memory_space<vmem>>, vector<8x128xf32>
      tpu.vector_store %arg6[%c0_147, %c0_148], %372 {strides = array<i32>} : memref<8x128xf32, #tpu.memory_space<vmem>>, vector<8x128xf32>,
    } else {
    }
    %c0 = arith.constant 0 : index
    %c0_1 = arith.constant 0 : index
    %3 = vector.load %arg5[%c0, %c0_1] : memref<8x128xf32, #tpu.memory_space<vmem>>, vector<8x128xf32>
    %c0_2 = arith.constant 0 : index
    %c0_3 = arith.constant 0 : index
    %4 = vector.load %arg6[%c0_2, %c0_3] : memref<8x128xf32, #tpu.memory_space<vmem>>, vector<8x128xf32>
    %c0_i32_4 = arith.constant 0 : i32
    %5 = arith.index_cast %c0_i32_4 : i32 to index
    %c0_5 = arith.constant 0 : index
    %c0_6 = arith.constant 0 : index
    %6 = vector.load %arg2[%5, %c0_5, %c0_6] : memref<8x8x512xbf16, #tpu.memory_space<vmem>>, vector<1x8x512xbf16>
    %7 = vector.shape_cast %6 : vector<1x8x512xbf16> to vector<8x512xbf16>
    %8 = arith.truncf %3 : vector<8x128xf32> to vector<8x128xbf16>
    %9 = vector.extract_strided_slice %7 {offsets = [0, 0], sizes = [8, 128], strides = [1, 1]} : vector<8x512xbf16> to vector<8x128xbf16>
    %10 = arith.extf %9 : vector<8x128xbf16> to vector<8x128xf32>
    %c0_7 = arith.constant 0 : index
    %c0_8 = arith.constant 0 : index
    %11 = vector.load %arg3[%c0_7, %c0_8] : memref<128x512xbf16, #tpu.memory_space<vmem>>, vector<128x128xbf16>
    %cst = arith.constant dense<0.000000e+00> : vector<8x128xf32>
    %12 = tpu.matmul %8, %11, %cst {dimension_numbers = #tpu.dot_dimension_numbers<[1], [0], [0], [1], [0, 0, 1, 1], [], []>} : vector<8x128xbf16>, vector<128x128xbf16>, vector<8x128xf32> -> vector<8x128xf32>
    %13 = arith.addf %10, %12 : vector<8x128xf32>
    %14 = arith.negf %13 : vector<8x128xf32>
    %15 = math.exp %14 : vector<8x128xf32>
    %cst_9 = arith.constant 1.000000e+00 : f32
    %16 = vector.broadcast %cst_9 : f32 to vector<8x128xf32>
    %17 = arith.addf %16, %15 : vector<8x128xf32>
    %18 = arith.divf %16, %17 : vector<8x128xf32>
    %19 = vector.extract_strided_slice %7 {offsets = [0, 128], sizes = [8, 128], strides = [1, 1]} : vector<8x512xbf16> to vector<8x128xbf16>
    %20 = arith.extf %19 : vector<8x128xbf16> to vector<8x128xf32>
    %c0_10 = arith.constant 0 : index
    %c128 = arith.constant 128 : index
    %21 = vector.load %arg3[%c0_10, %c128] : memref<128x512xbf16, #tpu.memory_space<vmem>>, vector<128x128xbf16>
    %cst_11 = arith.constant dense<0.000000e+00> : vector<8x128xf32>
    %22 = tpu.matmul %8, %21, %cst_11 {dimension_numbers = #tpu.dot_dimension_numbers<[1], [0], [0], [1], [0, 0, 1, 1], [], []>} : vector<8x128xbf16>, vector<128x128xbf16>, vector<8x128xf32> -> vector<8x128xf32>
    %23 = arith.addf %20, %22 : vector<8x128xf32>
    %24 = arith.negf %23 : vector<8x128xf32>
    %25 = math.exp %24 : vector<8x128xf32>
    %cst_12 = arith.constant 1.000000e+00 : f32
    %26 = vector.broadcast %cst_12 : f32 to vector<8x128xf32>
    %27 = arith.addf %26, %25 : vector<8x128xf32>
    %28 = arith.divf %26, %27 : vector<8x128xf32>
    %29 = vector.extract_strided_slice %7 {offsets = [0, 256], sizes = [8, 128], strides = [1, 1]} : vector<8x512xbf16> to vector<8x128xbf16>
    %30 = arith.extf %29 : vector<8x128xbf16> to vector<8x128xf32>
    %c0_13 = arith.constant 0 : index
    %c256 = arith.constant 256 : index
    %31 = vector.load %arg3[%c0_13, %c256] : memref<128x512xbf16, #tpu.memory_space<vmem>>, vector<128x128xbf16>
    %cst_14 = arith.constant dense<0.000000e+00> : vector<8x128xf32>
    %32 = tpu.matmul %8, %31, %cst_14 {dimension_numbers = #tpu.dot_dimension_numbers<[1], [0], [0], [1], [0, 0, 1, 1], [], []>} : vector<8x128xbf16>, vector<128x128xbf16>, vector<8x128xf32> -> vector<8x128xf32>
    %33 = arith.addf %30, %32 : vector<8x128xf32>
    %34 = math.tanh %33 : vector<8x128xf32>
    %35 = vector.extract_strided_slice %7 {offsets = [0, 384], sizes = [8, 128], strides = [1, 1]} : vector<8x512xbf16> to vector<8x128xbf16>
    %36 = arith.extf %35 : vector<8x128xbf16> to vector<8x128xf32>
    %c0_15 = arith.constant 0 : index
    %c384 = arith.constant 384 : index
    %37 = vector.load %arg3[%c0_15, %c384] : memref<128x512xbf16, #tpu.memory_space<vmem>>, vector<128x128xbf16>
    %cst_16 = arith.constant dense<0.000000e+00> : vector<8x128xf32>
    %38 = tpu.matmul %8, %37, %cst_16 {dimension_numbers = #tpu.dot_dimension_numbers<[1], [0], [0], [1], [0, 0, 1, 1], [], []>} : vector<8x128xbf16>, vector<128x128xbf16>, vector<8x128xf32> -> vector<8x128xf32>
    %39 = arith.addf %36, %38 : vector<8x128xf32>
    %40 = arith.negf %39 : vector<8x128xf32>
    %41 = math.exp %40 : vector<8x128xf32>
    %cst_17 = arith.constant 1.000000e+00 : f32
    %42 = vector.broadcast %cst_17 : f32 to vector<8x128xf32>
    %43 = arith.addf %42, %41 : vector<8x128xf32>
    %44 = arith.divf %42, %43 : vector<8x128xf32>
    %45 = arith.mulf %28, %4 : vector<8x128xf32>
    %46 = arith.mulf %18, %34 : vector<8x128xf32>
    %47 = arith.addf %45, %46 : vector<8x128xf32>
    %48 = math.tanh %47 : vector<8x128xf32>
    %49 = arith.mulf %44, %48 : vector<8x128xf32>
    %c1_i32 = arith.constant 1 : i32
    %50 = arith.index_cast %c1_i32 : i32 to index
    %c0_18 = arith.constant 0 : index
    %c0_19 = arith.constant 0 : index
    %51 = vector.load %arg2[%50, %c0_18, %c0_19] : memref<8x8x512xbf16, #tpu.memory_space<vmem>>, vector<1x8x512xbf16>
    %52 = vector.shape_cast %51 : vector<1x8x512xbf16> to vector<8x512xbf16>
    %53 = arith.truncf %49 : vector<8x128xf32> to vector<8x128xbf16>
    %54 = vector.extract_strided_slice %52 {offsets = [0, 0], sizes = [8, 128], strides = [1, 1]} : vector<8x512xbf16> to vector<8x128xbf16>
    %55 = arith.extf %54 : vector<8x128xbf16> to vector<8x128xf32>
    %c0_20 = arith.constant 0 : index
    %c0_21 = arith.constant 0 : index
    %56 = vector.load %arg3[%c0_20, %c0_21] : memref<128x512xbf16, #tpu.memory_space<vmem>>, vector<128x128xbf16>
    %cst_22 = arith.constant dense<0.000000e+00> : vector<8x128xf32>
    %57 = tpu.matmul %53, %56, %cst_22 {dimension_numbers = #tpu.dot_dimension_numbers<[1], [0], [0], [1], [0, 0, 1, 1], [], []>} : vector<8x128xbf16>, vector<128x128xbf16>, vector<8x128xf32> -> vector<8x128xf32>
    %58 = arith.addf %55, %57 : vector<8x128xf32>
    %59 = arith.negf %58 : vector<8x128xf32>
    %60 = math.exp %59 : vector<8x128xf32>
    %cst_23 = arith.constant 1.000000e+00 : f32
    %61 = vector.broadcast %cst_23 : f32 to vector<8x128xf32>
    %62 = arith.addf %61, %60 : vector<8x128xf32>
    %63 = arith.divf %61, %62 : vector<8x128xf32>
    %64 = vector.extract_strided_slice %52 {offsets = [0, 128], sizes = [8, 128], strides = [1, 1]} : vector<8x512xbf16> to vector<8x128xbf16>
    %65 = arith.extf %64 : vector<8x128xbf16> to vector<8x128xf32>
    %c0_24 = arith.constant 0 : index
    %c128_25 = arith.constant 128 : index
    %66 = vector.load %arg3[%c0_24, %c128_25] : memref<128x512xbf16, #tpu.memory_space<vmem>>, vector<128x128xbf16>
    %cst_26 = arith.constant dense<0.000000e+00> : vector<8x128xf32>
    %67 = tpu.matmul %53, %66, %cst_26 {dimension_numbers = #tpu.dot_dimension_numbers<[1], [0], [0], [1], [0, 0, 1, 1], [], []>} : vector<8x128xbf16>, vector<128x128xbf16>, vector<8x128xf32> -> vector<8x128xf32>
    %68 = arith.addf %65, %67 : vector<8x128xf32>
    %69 = arith.negf %68 : vector<8x128xf32>
    %70 = math.exp %69 : vector<8x128xf32>
    %cst_27 = arith.constant 1.000000e+00 : f32
    %71 = vector.broadcast %cst_27 : f32 to vector<8x128xf32>
    %72 = arith.addf %71, %70 : vector<8x128xf32>
    %73 = arith.divf %71, %72 : vector<8x128xf32>
    %74 = vector.extract_strided_slice %52 {offsets = [0, 256], sizes = [8, 128], strides = [1, 1]} : vector<8x512xbf16> to vector<8x128xbf16>
    %75 = arith.extf %74 : vector<8x128xbf16> to vector<8x128xf32>
    %c0_28 = arith.constant 0 : index
    %c256_29 = arith.constant 256 : index
    %76 = vector.load %arg3[%c0_28, %c256_29] : memref<128x512xbf16, #tpu.memory_space<vmem>>, vector<128x128xbf16>
    %cst_30 = arith.constant dense<0.000000e+00> : vector<8x128xf32>
    %77 = tpu.matmul %53, %76, %cst_30 {dimension_numbers = #tpu.dot_dimension_numbers<[1], [0], [0], [1], [0, 0, 1, 1], [], []>} : vector<8x128xbf16>, vector<128x128xbf16>, vector<8x128xf32> -> vector<8x128xf32>
    %78 = arith.addf %75, %77 : vector<8x128xf32>
    %79 = math.tanh %78 : vector<8x128xf32>
    %80 = vector.extract_strided_slice %52 {offsets = [0, 384], sizes = [8, 128], strides = [1, 1]} : vector<8x512xbf16> to vector<8x128xbf16>
    %81 = arith.extf %80 : vector<8x128xbf16> to vector<8x128xf32>
    %c0_31 = arith.constant 0 : index
    %c384_32 = arith.constant 384 : index
    %82 = vector.load %arg3[%c0_31, %c384_32] : memref<128x512xbf16, #tpu.memory_space<vmem>>, vector<128x128xbf16>
    %cst_33 = arith.constant dense<0.000000e+00> : vector<8x128xf32>
    %83 = tpu.matmul %53, %82, %cst_33 {dimension_numbers = #tpu.dot_dimension_numbers<[1], [0], [0], [1], [0, 0, 1, 1], [], []>} : vector<8x128xbf16>, vector<128x128xbf16>, vector<8x128xf32> -> vector<8x128xf32>
    %84 = arith.addf %81, %83 : vector<8x128xf32>
    %85 = arith.negf %84 : vector<8x128xf32>
    %86 = math.exp %85 : vector<8x128xf32>
    %cst_34 = arith.constant 1.000000e+00 : f32
    %87 = vector.broadcast %cst_34 : f32 to vector<8x128xf32>
    %88 = arith.addf %87, %86 : vector<8x128xf32>
    %89 = arith.divf %87, %88 : vector<8x128xf32>
    %90 = arith.mulf %73, %47 : vector<8x128xf32>
    %91 = arith.mulf %63, %79 : vector<8x128xf32>
    %92 = arith.addf %90, %91 : vector<8x128xf32>
    %93 = math.tanh %92 : vector<8x128xf32>
    %94 = arith.mulf %89, %93 : vector<8x128xf32>
    %c2_i32 = arith.constant 2 : i32
    %95 = arith.index_cast %c2_i32 : i32 to index
    %c0_35 = arith.constant 0 : index
    %c0_36 = arith.constant 0 : index
    %96 = vector.load %arg2[%95, %c0_35, %c0_36] : memref<8x8x512xbf16, #tpu.memory_space<vmem>>, vector<1x8x512xbf16>
    %97 = vector.shape_cast %96 : vector<1x8x512xbf16> to vector<8x512xbf16>
    %98 = arith.truncf %94 : vector<8x128xf32> to vector<8x128xbf16>
    %99 = vector.extract_strided_slice %97 {offsets = [0, 0], sizes = [8, 128], strides = [1, 1]} : vector<8x512xbf16> to vector<8x128xbf16>
    %100 = arith.extf %99 : vector<8x128xbf16> to vector<8x128xf32>
    %c0_37 = arith.constant 0 : index
    %c0_38 = arith.constant 0 : index
    %101 = vector.load %arg3[%c0_37, %c0_38] : memref<128x512xbf16, #tpu.memory_space<vmem>>, vector<128x128xbf16>
    %cst_39 = arith.constant dense<0.000000e+00> : vector<8x128xf32>
    %102 = tpu.matmul %98, %101, %cst_39 {dimension_numbers = #tpu.dot_dimension_numbers<[1], [0], [0], [1], [0, 0, 1, 1], [], []>} : vector<8x128xbf16>, vector<128x128xbf16>, vector<8x128xf32> -> vector<8x128xf32>
    %103 = arith.addf %100, %102 : vector<8x128xf32>
    %104 = arith.negf %103 : vector<8x128xf32>
    %105 = math.exp %104 : vector<8x128xf32>
    %cst_40 = arith.constant 1.000000e+00 : f32
    %106 = vector.broadcast %cst_40 : f32 to vector<8x128xf32>
    %107 = arith.addf %106, %105 : vector<8x128xf32>
    %108 = arith.divf %106, %107 : vector<8x128xf32>
    %109 = vector.extract_strided_slice %97 {offsets = [0, 128], sizes = [8, 128], strides = [1, 1]} : vector<8x512xbf16> to vector<8x128xbf16>
    %110 = arith.extf %109 : vector<8x128xbf16> to vector<8x128xf32>
    %c0_41 = arith.constant 0 : index
    %c128_42 = arith.constant 128 : index
    %111 = vector.load %arg3[%c0_41, %c128_42] : memref<128x512xbf16, #tpu.memory_space<vmem>>, vector<128x128xbf16>
    %cst_43 = arith.constant dense<0.000000e+00> : vector<8x128xf32>
    %112 = tpu.matmul %98, %111, %cst_43 {dimension_numbers = #tpu.dot_dimension_numbers<[1], [0], [0], [1], [0, 0, 1, 1], [], []>} : vector<8x128xbf16>, vector<128x128xbf16>, vector<8x128xf32> -> vector<8x128xf32>
    %113 = arith.addf %110, %112 : vector<8x128xf32>
    %114 = arith.negf %113 : vector<8x128xf32>
    %115 = math.exp %114 : vector<8x128xf32>
    %cst_44 = arith.constant 1.000000e+00 : f32
    %116 = vector.broadcast %cst_44 : f32 to vector<8x128xf32>
    %117 = arith.addf %116, %115 : vector<8x128xf32>
    %118 = arith.divf %116, %117 : vector<8x128xf32>
    %119 = vector.extract_strided_slice %97 {offsets = [0, 256], sizes = [8, 128], strides = [1, 1]} : vector<8x512xbf16> to vector<8x128xbf16>
    %120 = arith.extf %119 : vector<8x128xbf16> to vector<8x128xf32>
    %c0_45 = arith.constant 0 : index
    %c256_46 = arith.constant 256 : index
    %121 = vector.load %arg3[%c0_45, %c256_46] : memref<128x512xbf16, #tpu.memory_space<vmem>>, vector<128x128xbf16>
    %cst_47 = arith.constant dense<0.000000e+00> : vector<8x128xf32>
    %122 = tpu.matmul %98, %121, %cst_47 {dimension_numbers = #tpu.dot_dimension_numbers<[1], [0], [0], [1], [0, 0, 1, 1], [], []>} : vector<8x128xbf16>, vector<128x128xbf16>, vector<8x128xf32> -> vector<8x128xf32>
    %123 = arith.addf %120, %122 : vector<8x128xf32>
    %124 = math.tanh %123 : vector<8x128xf32>
    %125 = vector.extract_strided_slice %97 {offsets = [0, 384], sizes = [8, 128], strides = [1, 1]} : vector<8x512xbf16> to vector<8x128xbf16>
    %126 = arith.extf %125 : vector<8x128xbf16> to vector<8x128xf32>
    %c0_48 = arith.constant 0 : index
    %c384_49 = arith.constant 384 : index
    %127 = vector.load %arg3[%c0_48, %c384_49] : memref<128x512xbf16, #tpu.memory_space<vmem>>, vector<128x128xbf16>
    %cst_50 = arith.constant dense<0.000000e+00> : vector<8x128xf32>
    %128 = tpu.matmul %98, %127, %cst_50 {dimension_numbers = #tpu.dot_dimension_numbers<[1], [0], [0], [1], [0, 0, 1, 1], [], []>} : vector<8x128xbf16>, vector<128x128xbf16>, vector<8x128xf32> -> vector<8x128xf32>
    %129 = arith.addf %126, %128 : vector<8x128xf32>
    %130 = arith.negf %129 : vector<8x128xf32>
    %131 = math.exp %130 : vector<8x128xf32>
    %cst_51 = arith.constant 1.000000e+00 : f32
    %132 = vector.broadcast %cst_51 : f32 to vector<8x128xf32>
    %133 = arith.addf %132, %131 : vector<8x128xf32>
    %134 = arith.divf %132, %133 : vector<8x128xf32>
    %135 = arith.mulf %118, %92 : vector<8x128xf32>
    %136 = arith.mulf %108, %124 : vector<8x128xf32>
    %137 = arith.addf %135, %136 : vector<8x128xf32>
    %138 = math.tanh %137 : vector<8x128xf32>
    %139 = arith.mulf %134, %138 : vector<8x128xf32>
    %c3_i32 = arith.constant 3 : i32
    %140 = arith.index_cast %c3_i32 : i32 to index
    %c0_52 = arith.constant 0 : index
    %c0_53 = arith.constant 0 : index
    %141 = vector.load %arg2[%140, %c0_52, %c0_53] : memref<8x8x512xbf16, #tpu.memory_space<vmem>>, vector<1x8x512xbf16>
    %142 = vector.shape_cast %141 : vector<1x8x512xbf16> to vector<8x512xbf16>
    %143 = arith.truncf %139 : vector<8x128xf32> to vector<8x128xbf16>
    %144 = vector.extract_strided_slice %142 {offsets = [0, 0], sizes = [8, 128], strides = [1, 1]} : vector<8x512xbf16> to vector<8x128xbf16>
    %145 = arith.extf %144 : vector<8x128xbf16> to vector<8x128xf32>
    %c0_54 = arith.constant 0 : index
    %c0_55 = arith.constant 0 : index
    %146 = vector.load %arg3[%c0_54, %c0_55] : memref<128x512xbf16, #tpu.memory_space<vmem>>, vector<128x128xbf16>
    %cst_56 = arith.constant dense<0.000000e+00> : vector<8x128xf32>
    %147 = tpu.matmul %143, %146, %cst_56 {dimension_numbers = #tpu.dot_dimension_numbers<[1], [0], [0], [1], [0, 0, 1, 1], [], []>} : vector<8x128xbf16>, vector<128x128xbf16>, vector<8x128xf32> -> vector<8x128xf32>
    %148 = arith.addf %145, %147 : vector<8x128xf32>
    %149 = arith.negf %148 : vector<8x128xf32>
    %150 = math.exp %149 : vector<8x128xf32>
    %cst_57 = arith.constant 1.000000e+00 : f32
    %151 = vector.broadcast %cst_57 : f32 to vector<8x128xf32>
    %152 = arith.addf %151, %150 : vector<8x128xf32>
    %153 = arith.divf %151, %152 : vector<8x128xf32>
    %154 = vector.extract_strided_slice %142 {offsets = [0, 128], sizes = [8, 128], strides = [1, 1]} : vector<8x512xbf16> to vector<8x128xbf16>
    %155 = arith.extf %154 : vector<8x128xbf16> to vector<8x128xf32>
    %c0_58 = arith.constant 0 : index
    %c128_59 = arith.constant 128 : index
    %156 = vector.load %arg3[%c0_58, %c128_59] : memref<128x512xbf16, #tpu.memory_space<vmem>>, vector<128x128xbf16>
    %cst_60 = arith.constant dense<0.000000e+00> : vector<8x128xf32>
    %157 = tpu.matmul %143, %156, %cst_60 {dimension_numbers = #tpu.dot_dimension_numbers<[1], [0], [0], [1], [0, 0, 1, 1], [], []>} : vector<8x128xbf16>, vector<128x128xbf16>, vector<8x128xf32> -> vector<8x128xf32>
    %158 = arith.addf %155, %157 : vector<8x128xf32>
    %159 = arith.negf %158 : vector<8x128xf32>
    %160 = math.exp %159 : vector<8x128xf32>
    %cst_61 = arith.constant 1.000000e+00 : f32
    %161 = vector.broadcast %cst_61 : f32 to vector<8x128xf32>
    %162 = arith.addf %161, %160 : vector<8x128xf32>
    %163 = arith.divf %161, %162 : vector<8x128xf32>
    %164 = vector.extract_strided_slice %142 {offsets = [0, 256], sizes = [8, 128], strides = [1, 1]} : vector<8x512xbf16> to vector<8x128xbf16>
    %165 = arith.extf %164 : vector<8x128xbf16> to vector<8x128xf32>
    %c0_62 = arith.constant 0 : index
    %c256_63 = arith.constant 256 : index
    %166 = vector.load %arg3[%c0_62, %c256_63] : memref<128x512xbf16, #tpu.memory_space<vmem>>, vector<128x128xbf16>
    %cst_64 = arith.constant dense<0.000000e+00> : vector<8x128xf32>
    %167 = tpu.matmul %143, %166, %cst_64 {dimension_numbers = #tpu.dot_dimension_numbers<[1], [0], [0], [1], [0, 0, 1, 1], [], []>} : vector<8x128xbf16>, vector<128x128xbf16>, vector<8x128xf32> -> vector<8x128xf32>
    %168 = arith.addf %165, %167 : vector<8x128xf32>
    %169 = math.tanh %168 : vector<8x128xf32>
    %170 = vector.extract_strided_slice %142 {offsets = [0, 384], sizes = [8, 128], strides = [1, 1]} : vector<8x512xbf16> to vector<8x128xbf16>
    %171 = arith.extf %170 : vector<8x128xbf16> to vector<8x128xf32>
    %c0_65 = arith.constant 0 : index
    %c384_66 = arith.constant 384 : index
    %172 = vector.load %arg3[%c0_65, %c384_66] : memref<128x512xbf16, #tpu.memory_space<vmem>>, vector<128x128xbf16>
    %cst_67 = arith.constant dense<0.000000e+00> : vector<8x128xf32>
    %173 = tpu.matmul %143, %172, %cst_67 {dimension_numbers = #tpu.dot_dimension_numbers<[1], [0], [0], [1], [0, 0, 1, 1], [], []>} : vector<8x128xbf16>, vector<128x128xbf16>, vector<8x128xf32> -> vector<8x128xf32>
    %174 = arith.addf %171, %173 : vector<8x128xf32>
    %175 = arith.negf %174 : vector<8x128xf32>
    %176 = math.exp %175 : vector<8x128xf32>
    %cst_68 = arith.constant 1.000000e+00 : f32
    %177 = vector.broadcast %cst_68 : f32 to vector<8x128xf32>
    %178 = arith.addf %177, %176 : vector<8x128xf32>
    %179 = arith.divf %177, %178 : vector<8x128xf32>
    %180 = arith.mulf %163, %137 : vector<8x128xf32>
    %181 = arith.mulf %153, %169 : vector<8x128xf32>
    %182 = arith.addf %180, %181 : vector<8x128xf32>
    %183 = math.tanh %182 : vector<8x128xf32>
    %184 = arith.mulf %179, %183 : vector<8x128xf32>
    %c4_i32 = arith.constant 4 : i32
    %185 = arith.index_cast %c4_i32 : i32 to index
    %c0_69 = arith.constant 0 : index
    %c0_70 = arith.constant 0 : index
    %186 = vector.load %arg2[%185, %c0_69, %c0_70] : memref<8x8x512xbf16, #tpu.memory_space<vmem>>, vector<1x8x512xbf16>
    %187 = vector.shape_cast %186 : vector<1x8x512xbf16> to vector<8x512xbf16>
    %188 = arith.truncf %184 : vector<8x128xf32> to vector<8x128xbf16>
    %189 = vector.extract_strided_slice %187 {offsets = [0, 0], sizes = [8, 128], strides = [1, 1]} : vector<8x512xbf16> to vector<8x128xbf16>
    %190 = arith.extf %189 : vector<8x128xbf16> to vector<8x128xf32>
    %c0_71 = arith.constant 0 : index
    %c0_72 = arith.constant 0 : index
    %191 = vector.load %arg3[%c0_71, %c0_72] : memref<128x512xbf16, #tpu.memory_space<vmem>>, vector<128x128xbf16>
    %cst_73 = arith.constant dense<0.000000e+00> : vector<8x128xf32>
    %192 = tpu.matmul %188, %191, %cst_73 {dimension_numbers = #tpu.dot_dimension_numbers<[1], [0], [0], [1], [0, 0, 1, 1], [], []>} : vector<8x128xbf16>, vector<128x128xbf16>, vector<8x128xf32> -> vector<8x128xf32>
    %193 = arith.addf %190, %192 : vector<8x128xf32>
    %194 = arith.negf %193 : vector<8x128xf32>
    %195 = math.exp %194 : vector<8x128xf32>
    %cst_74 = arith.constant 1.000000e+00 : f32
    %196 = vector.broadcast %cst_74 : f32 to vector<8x128xf32>
    %197 = arith.addf %196, %195 : vector<8x128xf32>
    %198 = arith.divf %196, %197 : vector<8x128xf32>
    %199 = vector.extract_strided_slice %187 {offsets = [0, 128], sizes = [8, 128], strides = [1, 1]} : vector<8x512xbf16> to vector<8x128xbf16>
    %200 = arith.extf %199 : vector<8x128xbf16> to vector<8x128xf32>
    %c0_75 = arith.constant 0 : index
    %c128_76 = arith.constant 128 : index
    %201 = vector.load %arg3[%c0_75, %c128_76] : memref<128x512xbf16, #tpu.memory_space<vmem>>, vector<128x128xbf16>
    %cst_77 = arith.constant dense<0.000000e+00> : vector<8x128xf32>
    %202 = tpu.matmul %188, %201, %cst_77 {dimension_numbers = #tpu.dot_dimension_numbers<[1], [0], [0], [1], [0, 0, 1, 1], [], []>} : vector<8x128xbf16>, vector<128x128xbf16>, vector<8x128xf32> -> vector<8x128xf32>
    %203 = arith.addf %200, %202 : vector<8x128xf32>
    %204 = arith.negf %203 : vector<8x128xf32>
    %205 = math.exp %204 : vector<8x128xf32>
    %cst_78 = arith.constant 1.000000e+00 : f32
    %206 = vector.broadcast %cst_78 : f32 to vector<8x128xf32>
    %207 = arith.addf %206, %205 : vector<8x128xf32>
    %208 = arith.divf %206, %207 : vector<8x128xf32>
    %209 = vector.extract_strided_slice %187 {offsets = [0, 256], sizes = [8, 128], strides = [1, 1]} : vector<8x512xbf16> to vector<8x128xbf16>
    %210 = arith.extf %209 : vector<8x128xbf16> to vector<8x128xf32>
    %c0_79 = arith.constant 0 : index
    %c256_80 = arith.constant 256 : index
    %211 = vector.load %arg3[%c0_79, %c256_80] : memref<128x512xbf16, #tpu.memory_space<vmem>>, vector<128x128xbf16>
    %cst_81 = arith.constant dense<0.000000e+00> : vector<8x128xf32>
    %212 = tpu.matmul %188, %211, %cst_81 {dimension_numbers = #tpu.dot_dimension_numbers<[1], [0], [0], [1], [0, 0, 1, 1], [], []>} : vector<8x128xbf16>, vector<128x128xbf16>, vector<8x128xf32> -> vector<8x128xf32>
    %213 = arith.addf %210, %212 : vector<8x128xf32>
    %214 = math.tanh %213 : vector<8x128xf32>
    %215 = vector.extract_strided_slice %187 {offsets = [0, 384], sizes = [8, 128], strides = [1, 1]} : vector<8x512xbf16> to vector<8x128xbf16>
    %216 = arith.extf %215 : vector<8x128xbf16> to vector<8x128xf32>
    %c0_82 = arith.constant 0 : index
    %c384_83 = arith.constant 384 : index
    %217 = vector.load %arg3[%c0_82, %c384_83] : memref<128x512xbf16, #tpu.memory_space<vmem>>, vector<128x128xbf16>
    %cst_84 = arith.constant dense<0.000000e+00> : vector<8x128xf32>
    %218 = tpu.matmul %188, %217, %cst_84 {dimension_numbers = #tpu.dot_dimension_numbers<[1], [0], [0], [1], [0, 0, 1, 1], [], []>} : vector<8x128xbf16>, vector<128x128xbf16>, vector<8x128xf32> -> vector<8x128xf32>
    %219 = arith.addf %216, %218 : vector<8x128xf32>
    %220 = arith.negf %219 : vector<8x128xf32>
    %221 = math.exp %220 : vector<8x128xf32>
    %cst_85 = arith.constant 1.000000e+00 : f32
    %222 = vector.broadcast %cst_85 : f32 to vector<8x128xf32>
    %223 = arith.addf %222, %221 : vector<8x128xf32>
    %224 = arith.divf %222, %223 : vector<8x128xf32>
    %225 = arith.mulf %208, %182 : vector<8x128xf32>
    %226 = arith.mulf %198, %214 : vector<8x128xf32>
    %227 = arith.addf %225, %226 : vector<8x128xf32>
    %228 = math.tanh %227 : vector<8x128xf32>
    %229 = arith.mulf %224, %228 : vector<8x128xf32>
    %c5_i32 = arith.constant 5 : i32
    %230 = arith.index_cast %c5_i32 : i32 to index
    %c0_86 = arith.constant 0 : index
    %c0_87 = arith.constant 0 : index
    %231 = vector.load %arg2[%230, %c0_86, %c0_87] : memref<8x8x512xbf16, #tpu.memory_space<vmem>>, vector<1x8x512xbf16>
    %232 = vector.shape_cast %231 : vector<1x8x512xbf16> to vector<8x512xbf16>
    %233 = arith.truncf %229 : vector<8x128xf32> to vector<8x128xbf16>
    %234 = vector.extract_strided_slice %232 {offsets = [0, 0], sizes = [8, 128], strides = [1, 1]} : vector<8x512xbf16> to vector<8x128xbf16>
    %235 = arith.extf %234 : vector<8x128xbf16> to vector<8x128xf32>
    %c0_88 = arith.constant 0 : index
    %c0_89 = arith.constant 0 : index
    %236 = vector.load %arg3[%c0_88, %c0_89] : memref<128x512xbf16, #tpu.memory_space<vmem>>, vector<128x128xbf16>
    %cst_90 = arith.constant dense<0.000000e+00> : vector<8x128xf32>
    %237 = tpu.matmul %233, %236, %cst_90 {dimension_numbers = #tpu.dot_dimension_numbers<[1], [0], [0], [1], [0, 0, 1, 1], [], []>} : vector<8x128xbf16>, vector<128x128xbf16>, vector<8x128xf32> -> vector<8x128xf32>
    %238 = arith.addf %235, %237 : vector<8x128xf32>
    %239 = arith.negf %238 : vector<8x128xf32>
    %240 = math.exp %239 : vector<8x128xf32>
    %cst_91 = arith.constant 1.000000e+00 : f32
    %241 = vector.broadcast %cst_91 : f32 to vector<8x128xf32>
    %242 = arith.addf %241, %240 : vector<8x128xf32>
    %243 = arith.divf %241, %242 : vector<8x128xf32>
    %244 = vector.extract_strided_slice %232 {offsets = [0, 128], sizes = [8, 128], strides = [1, 1]} : vector<8x512xbf16> to vector<8x128xbf16>
    %245 = arith.extf %244 : vector<8x128xbf16> to vector<8x128xf32>
    %c0_92 = arith.constant 0 : index
    %c128_93 = arith.constant 128 : index
    %246 = vector.load %arg3[%c0_92, %c128_93] : memref<128x512xbf16, #tpu.memory_space<vmem>>, vector<128x128xbf16>
    %cst_94 = arith.constant dense<0.000000e+00> : vector<8x128xf32>
    %247 = tpu.matmul %233, %246, %cst_94 {dimension_numbers = #tpu.dot_dimension_numbers<[1], [0], [0], [1], [0, 0, 1, 1], [], []>} : vector<8x128xbf16>, vector<128x128xbf16>, vector<8x128xf32> -> vector<8x128xf32>
    %248 = arith.addf %245, %247 : vector<8x128xf32>
    %249 = arith.negf %248 : vector<8x128xf32>
    %250 = math.exp %249 : vector<8x128xf32>
    %cst_95 = arith.constant 1.000000e+00 : f32
    %251 = vector.broadcast %cst_95 : f32 to vector<8x128xf32>
    %252 = arith.addf %251, %250 : vector<8x128xf32>
    %253 = arith.divf %251, %252 : vector<8x128xf32>
    %254 = vector.extract_strided_slice %232 {offsets = [0, 256], sizes = [8, 128], strides = [1, 1]} : vector<8x512xbf16> to vector<8x128xbf16>
    %255 = arith.extf %254 : vector<8x128xbf16> to vector<8x128xf32>
    %c0_96 = arith.constant 0 : index
    %c256_97 = arith.constant 256 : index
    %256 = vector.load %arg3[%c0_96, %c256_97] : memref<128x512xbf16, #tpu.memory_space<vmem>>, vector<128x128xbf16>
    %cst_98 = arith.constant dense<0.000000e+00> : vector<8x128xf32>
    %257 = tpu.matmul %233, %256, %cst_98 {dimension_numbers = #tpu.dot_dimension_numbers<[1], [0], [0], [1], [0, 0, 1, 1], [], []>} : vector<8x128xbf16>, vector<128x128xbf16>, vector<8x128xf32> -> vector<8x128xf32>
    %258 = arith.addf %255, %257 : vector<8x128xf32>
    %259 = math.tanh %258 : vector<8x128xf32>
    %260 = vector.extract_strided_slice %232 {offsets = [0, 384], sizes = [8, 128], strides = [1, 1]} : vector<8x512xbf16> to vector<8x128xbf16>
    %261 = arith.extf %260 : vector<8x128xbf16> to vector<8x128xf32>
    %c0_99 = arith.constant 0 : index
    %c384_100 = arith.constant 384 : index
    %262 = vector.load %arg3[%c0_99, %c384_100] : memref<128x512xbf16, #tpu.memory_space<vmem>>, vector<128x128xbf16>
    %cst_101 = arith.constant dense<0.000000e+00> : vector<8x128xf32>
    %263 = tpu.matmul %233, %262, %cst_101 {dimension_numbers = #tpu.dot_dimension_numbers<[1], [0], [0], [1], [0, 0, 1, 1], [], []>} : vector<8x128xbf16>, vector<128x128xbf16>, vector<8x128xf32> -> vector<8x128xf32>
    %264 = arith.addf %261, %263 : vector<8x128xf32>
    %265 = arith.negf %264 : vector<8x128xf32>
    %266 = math.exp %265 : vector<8x128xf32>
    %cst_102 = arith.constant 1.000000e+00 : f32
    %267 = vector.broadcast %cst_102 : f32 to vector<8x128xf32>
    %268 = arith.addf %267, %266 : vector<8x128xf32>
    %269 = arith.divf %267, %268 : vector<8x128xf32>
    %270 = arith.mulf %253, %227 : vector<8x128xf32>
    %271 = arith.mulf %243, %259 : vector<8x128xf32>
    %272 = arith.addf %270, %271 : vector<8x128xf32>
    %273 = math.tanh %272 : vector<8x128xf32>
    %274 = arith.mulf %269, %273 : vector<8x128xf32>
    %c6_i32 = arith.constant 6 : i32
    %275 = arith.index_cast %c6_i32 : i32 to index
    %c0_103 = arith.constant 0 : index
    %c0_104 = arith.constant 0 : index
    %276 = vector.load %arg2[%275, %c0_103, %c0_104] : memref<8x8x512xbf16, #tpu.memory_space<vmem>>, vector<1x8x512xbf16>
    %277 = vector.shape_cast %276 : vector<1x8x512xbf16> to vector<8x512xbf16>
    %278 = arith.truncf %274 : vector<8x128xf32> to vector<8x128xbf16>
    %279 = vector.extract_strided_slice %277 {offsets = [0, 0], sizes = [8, 128], strides = [1, 1]} : vector<8x512xbf16> to vector<8x128xbf16>
    %280 = arith.extf %279 : vector<8x128xbf16> to vector<8x128xf32>
    %c0_105 = arith.constant 0 : index
    %c0_106 = arith.constant 0 : index
    %281 = vector.load %arg3[%c0_105, %c0_106] : memref<128x512xbf16, #tpu.memory_space<vmem>>, vector<128x128xbf16>
    %cst_107 = arith.constant dense<0.000000e+00> : vector<8x128xf32>
    %282 = tpu.matmul %278, %281, %cst_107 {dimension_numbers = #tpu.dot_dimension_numbers<[1], [0], [0], [1], [0, 0, 1, 1], [], []>} : vector<8x128xbf16>, vector<128x128xbf16>, vector<8x128xf32> -> vector<8x128xf32>
    %283 = arith.addf %280, %282 : vector<8x128xf32>
    %284 = arith.negf %283 : vector<8x128xf32>
    %285 = math.exp %284 : vector<8x128xf32>
    %cst_108 = arith.constant 1.000000e+00 : f32
    %286 = vector.broadcast %cst_108 : f32 to vector<8x128xf32>
    %287 = arith.addf %286, %285 : vector<8x128xf32>
    %288 = arith.divf %286, %287 : vector<8x128xf32>
    %289 = vector.extract_strided_slice %277 {offsets = [0, 128], sizes = [8, 128], strides = [1, 1]} : vector<8x512xbf16> to vector<8x128xbf16>
    %290 = arith.extf %289 : vector<8x128xbf16> to vector<8x128xf32>
    %c0_109 = arith.constant 0 : index
    %c128_110 = arith.constant 128 : index
    %291 = vector.load %arg3[%c0_109, %c128_110] : memref<128x512xbf16, #tpu.memory_space<vmem>>, vector<128x128xbf16>
    %cst_111 = arith.constant dense<0.000000e+00> : vector<8x128xf32>
    %292 = tpu.matmul %278, %291, %cst_111 {dimension_numbers = #tpu.dot_dimension_numbers<[1], [0], [0], [1], [0, 0, 1, 1], [], []>} : vector<8x128xbf16>, vector<128x128xbf16>, vector<8x128xf32> -> vector<8x128xf32>
    %293 = arith.addf %290, %292 : vector<8x128xf32>
    %294 = arith.negf %293 : vector<8x128xf32>
    %295 = math.exp %294 : vector<8x128xf32>
    %cst_112 = arith.constant 1.000000e+00 : f32
    %296 = vector.broadcast %cst_112 : f32 to vector<8x128xf32>
    %297 = arith.addf %296, %295 : vector<8x128xf32>
    %298 = arith.divf %296, %297 : vector<8x128xf32>
    %299 = vector.extract_strided_slice %277 {offsets = [0, 256], sizes = [8, 128], strides = [1, 1]} : vector<8x512xbf16> to vector<8x128xbf16>
    %300 = arith.extf %299 : vector<8x128xbf16> to vector<8x128xf32>
    %c0_113 = arith.constant 0 : index
    %c256_114 = arith.constant 256 : index
    %301 = vector.load %arg3[%c0_113, %c256_114] : memref<128x512xbf16, #tpu.memory_space<vmem>>, vector<128x128xbf16>
    %cst_115 = arith.constant dense<0.000000e+00> : vector<8x128xf32>
    %302 = tpu.matmul %278, %301, %cst_115 {dimension_numbers = #tpu.dot_dimension_numbers<[1], [0], [0], [1], [0, 0, 1, 1], [], []>} : vector<8x128xbf16>, vector<128x128xbf16>, vector<8x128xf32> -> vector<8x128xf32>
    %303 = arith.addf %300, %302 : vector<8x128xf32>
    %304 = math.tanh %303 : vector<8x128xf32>
    %305 = vector.extract_strided_slice %277 {offsets = [0, 384], sizes = [8, 128], strides = [1, 1]} : vector<8x512xbf16> to vector<8x128xbf16>
    %306 = arith.extf %305 : vector<8x128xbf16> to vector<8x128xf32>
    %c0_116 = arith.constant 0 : index
    %c384_117 = arith.constant 384 : index
    %307 = vector.load %arg3[%c0_116, %c384_117] : memref<128x512xbf16, #tpu.memory_space<vmem>>, vector<128x128xbf16>
    %cst_118 = arith.constant dense<0.000000e+00> : vector<8x128xf32>
    %308 = tpu.matmul %278, %307, %cst_118 {dimension_numbers = #tpu.dot_dimension_numbers<[1], [0], [0], [1], [0, 0, 1, 1], [], []>} : vector<8x128xbf16>, vector<128x128xbf16>, vector<8x128xf32> -> vector<8x128xf32>
    %309 = arith.addf %306, %308 : vector<8x128xf32>
    %310 = arith.negf %309 : vector<8x128xf32>
    %311 = math.exp %310 : vector<8x128xf32>
    %cst_119 = arith.constant 1.000000e+00 : f32
    %312 = vector.broadcast %cst_119 : f32 to vector<8x128xf32>
    %313 = arith.addf %312, %311 : vector<8x128xf32>
    %314 = arith.divf %312, %313 : vector<8x128xf32>
    %315 = arith.mulf %298, %272 : vector<8x128xf32>
    %316 = arith.mulf %288, %304 : vector<8x128xf32>
    %317 = arith.addf %315, %316 : vector<8x128xf32>
    %318 = math.tanh %317 : vector<8x128xf32>
    %319 = arith.mulf %314, %318 : vector<8x128xf32>
    %c7_i32 = arith.constant 7 : i32
    %320 = arith.index_cast %c7_i32 : i32 to index
    %c0_120 = arith.constant 0 : index
    %c0_121 = arith.constant 0 : index
    %321 = vector.load %arg2[%320, %c0_120, %c0_121] : memref<8x8x512xbf16, #tpu.memory_space<vmem>>, vector<1x8x512xbf16>
    %322 = vector.shape_cast %321 : vector<1x8x512xbf16> to vector<8x512xbf16>
    %323 = arith.truncf %319 : vector<8x128xf32> to vector<8x128xbf16>
    %324 = vector.extract_strided_slice %322 {offsets = [0, 0], sizes = [8, 128], strides = [1, 1]} : vector<8x512xbf16> to vector<8x128xbf16>
    %325 = arith.extf %324 : vector<8x128xbf16> to vector<8x128xf32>
    %c0_122 = arith.constant 0 : index
    %c0_123 = arith.constant 0 : index
    %326 = vector.load %arg3[%c0_122, %c0_123] : memref<128x512xbf16, #tpu.memory_space<vmem>>, vector<128x128xbf16>
    %cst_124 = arith.constant dense<0.000000e+00> : vector<8x128xf32>
    %327 = tpu.matmul %323, %326, %cst_124 {dimension_numbers = #tpu.dot_dimension_numbers<[1], [0], [0], [1], [0, 0, 1, 1], [], []>} : vector<8x128xbf16>, vector<128x128xbf16>, vector<8x128xf32> -> vector<8x128xf32>
    %328 = arith.addf %325, %327 : vector<8x128xf32>
    %329 = arith.negf %328 : vector<8x128xf32>
    %330 = math.exp %329 : vector<8x128xf32>
    %cst_125 = arith.constant 1.000000e+00 : f32
    %331 = vector.broadcast %cst_125 : f32 to vector<8x128xf32>
    %332 = arith.addf %331, %330 : vector<8x128xf32>
    %333 = arith.divf %331, %332 : vector<8x128xf32>
    %334 = vector.extract_strided_slice %322 {offsets = [0, 128], sizes = [8, 128], strides = [1, 1]} : vector<8x512xbf16> to vector<8x128xbf16>
    %335 = arith.extf %334 : vector<8x128xbf16> to vector<8x128xf32>
    %c0_126 = arith.constant 0 : index
    %c128_127 = arith.constant 128 : index
    %336 = vector.load %arg3[%c0_126, %c128_127] : memref<128x512xbf16, #tpu.memory_space<vmem>>, vector<128x128xbf16>
    %cst_128 = arith.constant dense<0.000000e+00> : vector<8x128xf32>
    %337 = tpu.matmul %323, %336, %cst_128 {dimension_numbers = #tpu.dot_dimension_numbers<[1], [0], [0], [1], [0, 0, 1, 1], [], []>} : vector<8x128xbf16>, vector<128x128xbf16>, vector<8x128xf32> -> vector<8x128xf32>
    %338 = arith.addf %335, %337 : vector<8x128xf32>
    %339 = arith.negf %338 : vector<8x128xf32>
    %340 = math.exp %339 : vector<8x128xf32>
    %cst_129 = arith.constant 1.000000e+00 : f32
    %341 = vector.broadcast %cst_129 : f32 to vector<8x128xf32>
    %342 = arith.addf %341, %340 : vector<8x128xf32>
    %343 = arith.divf %341, %342 : vector<8x128xf32>
    %344 = vector.extract_strided_slice %322 {offsets = [0, 256], sizes = [8, 128], strides = [1, 1]} : vector<8x512xbf16> to vector<8x128xbf16>
    %345 = arith.extf %344 : vector<8x128xbf16> to vector<8x128xf32>
    %c0_130 = arith.constant 0 : index
    %c256_131 = arith.constant 256 : index
    %346 = vector.load %arg3[%c0_130, %c256_131] : memref<128x512xbf16, #tpu.memory_space<vmem>>, vector<128x128xbf16>
    %cst_132 = arith.constant dense<0.000000e+00> : vector<8x128xf32>
    %347 = tpu.matmul %323, %346, %cst_132 {dimension_numbers = #tpu.dot_dimension_numbers<[1], [0], [0], [1], [0, 0, 1, 1], [], []>} : vector<8x128xbf16>, vector<128x128xbf16>, vector<8x128xf32> -> vector<8x128xf32>
    %348 = arith.addf %345, %347 : vector<8x128xf32>
    %349 = math.tanh %348 : vector<8x128xf32>
    %350 = vector.extract_strided_slice %322 {offsets = [0, 384], sizes = [8, 128], strides = [1, 1]} : vector<8x512xbf16> to vector<8x128xbf16>
    %351 = arith.extf %350 : vector<8x128xbf16> to vector<8x128xf32>
    %c0_133 = arith.constant 0 : index
    %c384_134 = arith.constant 384 : index
    %352 = vector.load %arg3[%c0_133, %c384_134] : memref<128x512xbf16, #tpu.memory_space<vmem>>, vector<128x128xbf16>
    %cst_135 = arith.constant dense<0.000000e+00> : vector<8x128xf32>
    %353 = tpu.matmul %323, %352, %cst_135 {dimension_numbers = #tpu.dot_dimension_numbers<[1], [0], [0], [1], [0, 0, 1, 1], [], []>} : vector<8x128xbf16>, vector<128x128xbf16>, vector<8x128xf32> -> vector<8x128xf32>
    %354 = arith.addf %351, %353 : vector<8x128xf32>
    %355 = arith.negf %354 : vector<8x128xf32>
    %356 = math.exp %355 : vector<8x128xf32>
    %cst_136 = arith.constant 1.000000e+00 : f32
    %357 = vector.broadcast %cst_136 : f32 to vector<8x128xf32>
    %358 = arith.addf %357, %356 : vector<8x128xf32>
    %359 = arith.divf %357, %358 : vector<8x128xf32>
    %360 = arith.mulf %343, %317 : vector<8x128xf32>
    %361 = arith.mulf %333, %349 : vector<8x128xf32>
    %362 = arith.addf %360, %361 : vector<8x128xf32>
    %363 = math.tanh %362 : vector<8x128xf32>
    %364 = arith.mulf %359, %363 : vector<8x128xf32>
    %c8_i32 = arith.constant 8 : i32
    %c0_137 = arith.constant 0 : index
    %c0_138 = arith.constant 0 : index
    %365 = vector.load %arg5[%c0_137, %c0_138] : memref<8x128xf32, #tpu.memory_space<vmem>>, vector<8x128xf32>
    tpu.vector_store %arg5[%c0_137, %c0_138], %364 {strides = array<i32>} : memref<8x128xf32, #tpu.memory_space<vmem>>, vector<8x128xf32>,
    %c0_139 = arith.constant 0 : index
    %c0_140 = arith.constant 0 : index
    %366 = vector.load %arg6[%c0_139, %c0_140] : memref<8x128xf32, #tpu.memory_space<vmem>>, vector<8x128xf32>
    tpu.vector_store %arg6[%c0_139, %c0_140], %362 {strides = array<i32>} : memref<8x128xf32, #tpu.memory_space<vmem>>, vector<8x128xf32>,
    %c0_i32_141 = arith.constant 0 : i32
    %367 = arith.cmpi eq, %arg1, %c0_i32_141 : i32
    %368 = arith.extui %367 : i1 to i32
    %c0_i32_142 = arith.constant 0 : i32
    %369 = arith.cmpi ne, %368, %c0_i32_142 : i32
    scf.if %369 {
      %c0_143 = arith.constant 0 : index
      %c0_144 = arith.constant 0 : index
      %370 = vector.load %arg4[%c0_143, %c0_144] : memref<8x128xf32, #tpu.memory_space<vmem>>, vector<8x128xf32>
      tpu.vector_store %arg4[%c0_143, %c0_144], %364 {strides = array<i32>} : memref<8x128xf32, #tpu.memory_space<vmem>>, vector<8x128xf32>,
    } else {
    }
    return
  }
  func.func @transform_0(%arg0: i32, %arg1: i32) -> (i32, i32, i32) {
    %c0_i32 = arith.constant 0 : i32
    %c0_i32_0 = arith.constant 0 : i32
    return %arg1, %arg0, %c0_i32 : i32, i32, i32
  }
  func.func @transform_1(%arg0: i32, %arg1: i32) -> (i32, i32) {
    %c0_i32 = arith.constant 0 : i32
    %c0_i32_0 = arith.constant 0 : i32
    %c0_i32_1 = arith.constant 0 : i32
    return %c0_i32, %c0_i32_0 : i32, i32
  }
  func.func @transform_2(%arg0: i32, %arg1: i32) -> (i32, i32) {
    %c0_i32 = arith.constant 0 : i32
    %c0_i32_0 = arith.constant 0 : i32
    return %arg0, %c0_i32 : i32, i32
  }
}

</mosaic_0001>

<bundles_post_ra>
// kernel: lstm_feature_extractor.1
= control target key start
LH: loop header
LB: loop body
LE: loop exit
PB: predicated region body
PF: predicated region fallthrough
CT: control target
= control target key end

     0   :  { %v3094_v0 = vmov 0.0   ;;  %vm3095_vm0 = vmmov 0   ;;  %v3096_v19 = vmov 0.0|0.0   ;;  %s4087_s1 = inlined_call_operand.vmem [shape: bf16[128,512], index: 1, kind: input, shape index: {}]   ;;  %s4088_s0 = inlined_call_operand.vmem [shape: bf16[8,8,512], index: 0, kind: input, shape index: {}]   ;;  %s4089_s2 = inlined_call_operand.vmem [shape: f32[8,128], index: 2, kind: output, shape index: {}]  }
   0x1   :  { %2259 = vmatprep.subr.bf16.mxu0 %v3094_v0  ;;  %2279 = vmatprep.subr.bf16.mxu1 %v3094_v0  ;;  %v3117_v1 = vld [vmem:[%s4087_s1 + $0xe0] ss:$16 sps:$4 sm:$0xff]   ;;  %v3122_v2 = vld [vmem:[%s4087_s1 + $0xe4] ss:$16 sps:$4 sm:$0xff]   ;;  %v3230_v17 = vld [vmem:[%s4087_s1 + $0xe8] ss:$16 sps:$4 sm:$0xff]  }
   0x2   :  { %2275 = vmatprep.mubr.msk.bf16.mxu0 %vm3095_vm0, %v3094_v0  ;;  %2295 = vmatprep.mubr.msk.bf16.mxu1 %vm3095_vm0, %v3094_v0  ;;  %v3132_v3 = vld [vmem:[%s4087_s1 + $0xc0] ss:$16 sps:$4 sm:$0xff]   ;;  %v3139_v4 = vld [vmem:[%s4087_s1 + $0xc4] ss:$16 sps:$4 sm:$0xff]   ;;  %v3237_v18 = vld [vmem:[%s4087_s1 + $0xec] ss:$16 sps:$4 sm:$0xff]  }
   0x3   :  { %2260 = vmatpush3.bf16.msra.mxu0 %v3117_v1  ;;  %2280 = vmatpush3.bf16.msra.mxu1 %v3122_v2  ;;  %v3146_v5 = vld [vmem:[%s4087_s1 + $0xa0] ss:$16 sps:$4 sm:$0xff]   ;;  %v3153_v6 = vld [vmem:[%s4087_s1 + $0xa4] ss:$16 sps:$4 sm:$0xff]   ;;  %v3244_v20 = vld [vmem:[%s4087_s1 + $0xc8] ss:$16 sps:$4 sm:$0xff]  }
   0x4   :  { %2261 = vmatprep.subr.bf16.mxu0 %v3094_v0  ;;  %2281 = vmatprep.subr.bf16.mxu1 %v3094_v0  ;;  %v3160_v7 = vld [vmem:[%s4087_s1 + $0x80] ss:$16 sps:$4 sm:$0xff]   ;;  %v3167_v8 = vld [vmem:[%s4087_s1 + $0x84] ss:$16 sps:$4 sm:$0xff]   ;;  %v3251_v21 = vld [vmem:[%s4087_s1 + $0xcc] ss:$16 sps:$4 sm:$0xff]  }
   0x5   :  { %v3174_v9 = vld [vmem:[%s4087_s1 + $0x60] ss:$16 sps:$4 sm:$0xff]   ;;  %v3181_v10 = vld [vmem:[%s4087_s1 + $0x64] ss:$16 sps:$4 sm:$0xff]   ;;  %v3262_v22 = vld [vmem:[%s4087_s1 + $0xa8] ss:$16 sps:$4 sm:$0xff]  }
   0x6   :  { %v3188_v11 = vld [vmem:[%s4087_s1 + $0x40] ss:$16 sps:$4 sm:$0xff]   ;;  %v3195_v12 = vld [vmem:[%s4087_s1 + $0x44] ss:$16 sps:$4 sm:$0xff]   ;;  %v3269_v23 = vld [vmem:[%s4087_s1 + $0xac] ss:$16 sps:$4 sm:$0xff]  }
   0x7   :  { %2262 = vmatpush3.bf16.msra.mxu0 %v3132_v3  ;;  %2282 = vmatpush3.bf16.msra.mxu1 %v3139_v4  ;;  %v3202_v13 = vld [vmem:[%s4087_s1 + $0x20] ss:$16 sps:$4 sm:$0xff]   ;;  %v3209_v14 = vld [vmem:[%s4087_s1 + $0x24] ss:$16 sps:$4 sm:$0xff]   ;;  %v3276_v24 = vld [vmem:[%s4087_s1 + $0x88] ss:$16 sps:$4 sm:$0xff]  }
   0x8   :  { %2263 = vmatprep.subr.bf16.mxu0 %v3094_v0  ;;  %2283 = vmatprep.subr.bf16.mxu1 %v3094_v0  ;;  %v3216_v15 = vld [vmem:[%s4087_s1] ss:$16 sps:$4 sm:$0xff]   ;;  %v3223_v16 = vld [vmem:[%s4087_s1 + $0x4] ss:$16 sps:$4 sm:$0xff]   ;;  %v3283_v25 = vld [vmem:[%s4087_s1 + $0x8c] ss:$16 sps:$4 sm:$0xff]  }
   0x9   :  { %v3290_v26 = vld [vmem:[%s4087_s1 + $0x68] ss:$16 sps:$4 sm:$0xff]   ;;  %v3297_v27 = vld [vmem:[%s4087_s1 + $0x6c] ss:$16 sps:$4 sm:$0xff]   ;;  %v20_v34 = vld [vmem:[%s4088_s0] sm:$0xff] }
   0xa   :  { %v3304_v28 = vld [vmem:[%s4087_s1 + $0x48] ss:$16 sps:$4 sm:$0xff]   ;;  %v3311_v29 = vld [vmem:[%s4087_s1 + $0x4c] ss:$16 sps:$4 sm:$0xff]   ;;  %v136_v35 = vrot.slane %v20_v34, 4  ;;  %v23_v39 = vunpack.c.l.bf16 %v20_v34 }
   0xb   :  { %2264 = vmatpush3.bf16.msra.mxu0 %v3146_v5  ;;  %2284 = vmatpush3.bf16.msra.mxu1 %v3153_v6  ;;  %v3318_v30 = vld [vmem:[%s4087_s1 + $0x28] ss:$16 sps:$4 sm:$0xff]   ;;  %v3325_v31 = vld [vmem:[%s4087_s1 + $0x2c] ss:$16 sps:$4 sm:$0xff]  }
   0xc   :  { %2265 = vmatprep.subr.bf16.mxu0 %v3094_v0  ;;  %2285 = vmatprep.subr.bf16.mxu1 %v3094_v0  ;;  %v3332_v32 = vld [vmem:[%s4087_s1 + $0x8] ss:$16 sps:$4 sm:$0xff]   ;;  %v3339_v33 = vld [vmem:[%s4087_s1 + $0xc] ss:$16 sps:$4 sm:$0xff]   ;;  %v138_v37 = vunpack.c.l.bf16 %v136_v35 }
   0xd   :  { %v21_v50 = vld [vmem:[%s4088_s0 + $0x8] sm:$0xff] }
   0xe   :  { %v358_v52 = vrot.slane %v21_v50, 4  ;;  %v250_v55 = vunpack.c.l.bf16 %v21_v50  ;;  %v1936_v50 = vld [vmem:[%s4088_s0 + $0x10] sm:$0xff] }
   0xf   :  { %2266 = vmatpush3.bf16.msra.mxu0 %v3160_v7  ;;  %2286 = vmatpush3.bf16.msra.mxu1 %v3167_v8 }
  0x10   :  { %2267 = vmatprep.subr.bf16.mxu0 %v3094_v0  ;;  %2287 = vmatprep.subr.bf16.mxu1 %v3094_v0  ;;  %v360_v57 = vunpack.c.l.bf16 %v358_v52 }
  0x13   :  { %2268 = vmatpush3.bf16.msra.mxu0 %v3174_v9  ;;  %2288 = vmatpush3.bf16.msra.mxu1 %v3181_v10 }
  0x14   :  { %2269 = vmatprep.subr.bf16.mxu0 %v3094_v0  ;;  %2289 = vmatprep.subr.bf16.mxu1 %v3094_v0 }
  0x17   :  { %2270 = vmatpush3.bf16.msra.mxu0 %v3188_v11  ;;  %2290 = vmatpush3.bf16.msra.mxu1 %v3195_v12 }
  0x18   :  { %2271 = vmatprep.subr.bf16.mxu0 %v3094_v0  ;;  %2291 = vmatprep.subr.bf16.mxu1 %v3094_v0 }
  0x1b   :  { %2272 = vmatpush3.bf16.msra.mxu0 %v3202_v13  ;;  %2292 = vmatpush3.bf16.msra.mxu1 %v3209_v14 }
  0x1c   :  { %2273 = vmatprep.subr.bf16.mxu0 %v3094_v0  ;;  %2293 = vmatprep.subr.bf16.mxu1 %v3094_v0 }
  0x1f   :  { %2274 = vmatpush3.bf16.msra.mxu0 %v3216_v15  ;;  %2294 = vmatpush3.bf16.msra.mxu1 %v3223_v16 }
  0x20   :  { %2299 = vmatprep.subr.bf16.mxu0 %v3094_v0  ;;  %2319 = vmatprep.subr.bf16.mxu1 %v3094_v0 }
  0x22   :  { %2276 = vmatmul.mubr.bf16.vlgmr.msra.gmra.mxu0 %v3096_v19  ;;  %2296 = vmatmul.mubr.bf16.vlgmr.msra.gmra.mxu1 %v3096_v19 }
  0x23   :  { %2300 = vmatpush3.bf16.msra.mxu0 %v3230_v17  ;;  %2320 = vmatpush3.bf16.msra.mxu1 %v3237_v18 }
  0x24   :  { %2301 = vmatprep.subr.bf16.mxu0 %v3094_v0  ;;  %2321 = vmatprep.subr.bf16.mxu1 %v3094_v0 }
  0x25   :  { %2315 = vmatprep.mubr.msk.bf16.mxu0 %vm3095_vm0, %v3094_v0  ;;  %2335 = vmatprep.mubr.msk.bf16.mxu1 %vm3095_vm0, %v3094_v0 }
  0x27   :  { %2302 = vmatpush3.bf16.msra.mxu0 %v3244_v20  ;;  %2322 = vmatpush3.bf16.msra.mxu1 %v3251_v21 }
  0x28   :  { %2303 = vmatprep.subr.bf16.mxu0 %v3094_v0  ;;  %2323 = vmatprep.subr.bf16.mxu1 %v3094_v0 }
  0x2b   :  { %2304 = vmatpush3.bf16.msra.mxu0 %v3262_v22  ;;  %2324 = vmatpush3.bf16.msra.mxu1 %v3269_v23 }
  0x2c   :  { %2305 = vmatprep.subr.bf16.mxu0 %v3094_v0  ;;  %2325 = vmatprep.subr.bf16.mxu1 %v3094_v0 }
  0x2f   :  { %2306 = vmatpush3.bf16.msra.mxu0 %v3276_v24  ;;  %2326 = vmatpush3.bf16.msra.mxu1 %v3283_v25 }
  0x30   :  { %2307 = vmatprep.subr.bf16.mxu0 %v3094_v0  ;;  %2327 = vmatprep.subr.bf16.mxu1 %v3094_v0 }
  0x33   :  { %2308 = vmatpush3.bf16.msra.mxu0 %v3290_v26  ;;  %2328 = vmatpush3.bf16.msra.mxu1 %v3297_v27 }
  0x34   :  { %2309 = vmatprep.subr.bf16.mxu0 %v3094_v0  ;;  %2329 = vmatprep.subr.bf16.mxu1 %v3094_v0 }
  0x37   :  { %2310 = vmatpush3.bf16.msra.mxu0 %v3304_v28  ;;  %2330 = vmatpush3.bf16.msra.mxu1 %v3311_v29 }
  0x38   :  { %2311 = vmatprep.subr.bf16.mxu0 %v3094_v0  ;;  %2331 = vmatprep.subr.bf16.mxu1 %v3094_v0 }
  0x3b   :  { %2312 = vmatpush3.bf16.msra.mxu0 %v3318_v30  ;;  %2332 = vmatpush3.bf16.msra.mxu1 %v3325_v31 }
  0x3c   :  { %2313 = vmatprep.subr.bf16.mxu0 %v3094_v0  ;;  %2333 = vmatprep.subr.bf16.mxu1 %v3094_v0 }
  0x3f   :  { %2314 = vmatpush3.bf16.msra.mxu0 %v3332_v32  ;;  %2334 = vmatpush3.bf16.msra.mxu1 %v3339_v33 }
  0x40   :  { %2339 = vmatprep.subr.bf16.mxu0 %v3094_v0  ;;  %2359 = vmatprep.subr.bf16.mxu1 %v3094_v0 }
  0x42   :  { %2316 = vmatmul.mubr.bf16.vlgmr.msra.gmra.mxu0 %v3096_v19  ;;  %2336 = vmatmul.mubr.bf16.vlgmr.msra.gmra.mxu1 %v3096_v19 }
  0x43   :  { %2340 = vmatpush3.bf16.msra.mxu0 %v3117_v1  ;;  %2360 = vmatpush3.bf16.msra.mxu1 %v3122_v2 }
  0x44   :  { %2341 = vmatprep.subr.bf16.mxu0 %v3094_v0  ;;  %2361 = vmatprep.subr.bf16.mxu1 %v3094_v0 }
  0x45   :  { %2355 = vmatprep.mubr.msk.bf16.mxu0 %vm3095_vm0, %v3094_v0  ;;  %2375 = vmatprep.mubr.msk.bf16.mxu1 %vm3095_vm0, %v3094_v0 }
  0x47   :  { %2342 = vmatpush3.bf16.msra.mxu0 %v3132_v3  ;;  %2362 = vmatpush3.bf16.msra.mxu1 %v3139_v4 }
  0x48   :  { %2343 = vmatprep.subr.bf16.mxu0 %v3094_v0  ;;  %2363 = vmatprep.subr.bf16.mxu1 %v3094_v0 }
  0x4b   :  { %2344 = vmatpush3.bf16.msra.mxu0 %v3146_v5  ;;  %2364 = vmatpush3.bf16.msra.mxu1 %v3153_v6 }
  0x4c   :  { %2345 = vmatprep.subr.bf16.mxu0 %v3094_v0  ;;  %2365 = vmatprep.subr.bf16.mxu1 %v3094_v0 }
  0x4f   :  { %2346 = vmatpush3.bf16.msra.mxu0 %v3160_v7  ;;  %2366 = vmatpush3.bf16.msra.mxu1 %v3167_v8 }
  0x50   :  { %2347 = vmatprep.subr.bf16.mxu0 %v3094_v0  ;;  %2367 = vmatprep.subr.bf16.mxu1 %v3094_v0 }
  0x53   :  { %2348 = vmatpush3.bf16.msra.mxu0 %v3174_v9  ;;  %2368 = vmatpush3.bf16.msra.mxu1 %v3181_v10 }
  0x54   :  { %2349 = vmatprep.subr.bf16.mxu0 %v3094_v0  ;;  %2369 = vmatprep.subr.bf16.mxu1 %v3094_v0 }
  0x57   :  { %2350 = vmatpush3.bf16.msra.mxu0 %v3188_v11  ;;  %2370 = vmatpush3.bf16.msra.mxu1 %v3195_v12 }
  0x58   :  { %2351 = vmatprep.subr.bf16.mxu0 %v3094_v0  ;;  %2371 = vmatprep.subr.bf16.mxu1 %v3094_v0 }
  0x5b   :  { %2352 = vmatpush3.bf16.msra.mxu0 %v3202_v13  ;;  %2372 = vmatpush3.bf16.msra.mxu1 %v3209_v14 }
  0x5c   :  { %2353 = vmatprep.subr.bf16.mxu0 %v3094_v0  ;;  %2373 = vmatprep.subr.bf16.mxu1 %v3094_v0 }
  0x5f   :  { %2354 = vmatpush3.bf16.msra.mxu0 %v3216_v15  ;;  %2374 = vmatpush3.bf16.msra.mxu1 %v3223_v16 }
  0x60   :  { %2379 = vmatprep.subr.bf16.mxu0 %v3094_v0  ;;  %2399 = vmatprep.subr.bf16.mxu1 %v3094_v0 }
  0xe2   :  { %v122_v36 = vpop.f32.mrf.mxu0  ;;  %v237_v38 = vpop.f32.mrf.mxu1 }
  0xe3   :  { %v243_v43 = vadd.f32 %v237_v38, %v138_v37  ;;  %v128_v45 = vadd.f32 %v122_v36, %v23_v39 }
  0xe4   :  { %v2277_v40 = vpop.f32.mrf.mxu0  ;;  %v2297_v41 = vpop.f32.mrf.mxu1 }
  0xe5   :  { %v1918_v48 = vmul.f32 -1.442695, %v243_v43  ;;  %v1909_v49 = vmul.f32 -1.442695, %v128_v45 }
  0xe6   :  { %v125_v42 = vpop.f32.mrf.mxu0  ;;  %v240_v44 = vpop.f32.mrf.mxu1 }
  0xe7   :  { %2934 = vpow2.f32 %v1918_v48 }
  0xe8   :  { %v2278_v46 = vpop.f32.mrf.mxu0  ;;  %v2298_v47 = vpop.f32.mrf.mxu1  ;;  %2936 = vpow2.f32 %v1909_v49 }
  0xf4   :  { %v2935_v51 = vpop.eup %2934 }
  0xf5   :  { %v2937_v53 = vpop.eup %2936  ;;  %v247_v54 = vadd.f32 1.0, %v2935_v51  ;;  %v530_v51 = vrot.slane %v1936_v50, 4 }
  0xf6   :  { %v132_v56 = vadd.f32 1.0, %v2937_v53 }
  0xf7   :  { %2938 = vrcp.f32 %v247_v54  ;;  %v532_v54 = vunpack.c.l.bf16 %v530_v51 }
  0xf8   :  { %2940 = vrcp.f32 %v132_v56 }
 0x102   :  { %v349_v58 = vpop.f32.mrf.mxu0  ;;  %v459_v60 = vpop.f32.mrf.mxu1 }
 0x103   :  { %v355_v59 = vadd.f32 %v349_v58, %v250_v55  ;;  %v465_v61 = vadd.f32 %v459_v60, %v360_v57  ;;  %v481_v55 = vunpack.c.l.bf16 %v1936_v50 }
 0x104   :  { %v2317_v62 = vpop.f32.mrf.mxu0  ;;  %v2337_v63 = vpop.f32.mrf.mxu1 }
 0x105   :  { %2942 = vtanh.f32 %v355_v59  ;;  %v1935_v19 = vmul.f32 -1.442695, %v465_v61  ;;  %v2939_v38 = vpop.eup %2938 }
 0x106   :  { %v352_v34 = vpop.f32.mrf.mxu0  ;;  %v462_v35 = vpop.f32.mrf.mxu1  ;;  %v472_v41 = vmul.f32 0.0, %v2939_v38 }
 0x107   :  { %2944 = vpow2.f32 %v1935_v19  ;;  %v2941_v39 = vpop.eup %2940  ;;  %v1937_v35 = vld [vmem:[%s4088_s0 + $0x18] sm:$0xff] }
 0x108   :  { %v2318_v36 = vpop.f32.mrf.mxu0  ;;  %v2338_v37 = vpop.f32.mrf.mxu1 }
 0x109   :  { %v624_v36 = vrot.slane %v1937_v35, 4 }
 0x112   :  { %v2943_v40 = vpop.eup %2942 }
 0x113   :  { %v473_v42 = vmul.f32 %v2943_v40, %v2941_v39  ;;  %v580_v40 = vunpack.c.l.bf16 %v1937_v35 }
 0x114   :  { %v2945_v43 = vpop.eup %2944 }
 0x115   :  { %v3388_v44 = vadd.f32 %v473_v42, %v472_v41  ;;  %v469_v45 = vadd.f32 1.0, %v2945_v43  ;;  %v626_v41 = vunpack.c.l.bf16 %v624_v36 }
 0x117   :  { %2946 = vtanh.f32 %v3388_v44 }
 0x118   :  { %2948 = vrcp.f32 %v469_v45 }
 0x124   :  { %v2947_v46 = vpop.eup %2946 }
 0x125   :  { %v2949_v47 = vpop.eup %2948 }
 0x126   :  { %v476_v48 = vmul.f32 %v2949_v47, %v2947_v46 }
 0x128   :  { %v480_v49 = vpack.c.bf16 %v476_v48, %v476_v48 }
 0x12a   :  { %2356 = vmatmul.mubr.bf16.vlgmr.msra.gmra.mxu0 %v480_v49  ;;  %2376 = vmatmul.mubr.bf16.vlgmr.msra.gmra.mxu1 %v480_v49 }
 0x12b   :  { %2380 = vmatpush3.bf16.msra.mxu0 %v3230_v17  ;;  %2400 = vmatpush3.bf16.msra.mxu1 %v3237_v18 }
 0x12c   :  { %2381 = vmatprep.subr.bf16.mxu0 %v3094_v0  ;;  %2401 = vmatprep.subr.bf16.mxu1 %v3094_v0 }
 0x12d   :  { %2395 = vmatprep.mubr.msk.bf16.mxu0 %vm3095_vm0, %v3094_v0  ;;  %2415 = vmatprep.mubr.msk.bf16.mxu1 %vm3095_vm0, %v3094_v0 }
 0x12f   :  { %2382 = vmatpush3.bf16.msra.mxu0 %v3244_v20  ;;  %2402 = vmatpush3.bf16.msra.mxu1 %v3251_v21 }
 0x130   :  { %2383 = vmatprep.subr.bf16.mxu0 %v3094_v0  ;;  %2403 = vmatprep.subr.bf16.mxu1 %v3094_v0 }
 0x133   :  { %2384 = vmatpush3.bf16.msra.mxu0 %v3262_v22  ;;  %2404 = vmatpush3.bf16.msra.mxu1 %v3269_v23 }
 0x134   :  { %2385 = vmatprep.subr.bf16.mxu0 %v3094_v0  ;;  %2405 = vmatprep.subr.bf16.mxu1 %v3094_v0 }
 0x137   :  { %2386 = vmatpush3.bf16.msra.mxu0 %v3276_v24  ;;  %2406 = vmatpush3.bf16.msra.mxu1 %v3283_v25 }
 0x138   :  { %2387 = vmatprep.subr.bf16.mxu0 %v3094_v0  ;;  %2407 = vmatprep.subr.bf16.mxu1 %v3094_v0 }
 0x13b   :  { %2388 = vmatpush3.bf16.msra.mxu0 %v3290_v26  ;;  %2408 = vmatpush3.bf16.msra.mxu1 %v3297_v27 }
 0x13c   :  { %2389 = vmatprep.subr.bf16.mxu0 %v3094_v0  ;;  %2409 = vmatprep.subr.bf16.mxu1 %v3094_v0 }
 0x13f   :  { %2390 = vmatpush3.bf16.msra.mxu0 %v3304_v28  ;;  %2410 = vmatpush3.bf16.msra.mxu1 %v3311_v29 }
 0x140   :  { %2391 = vmatprep.subr.bf16.mxu0 %v3094_v0  ;;  %2411 = vmatprep.subr.bf16.mxu1 %v3094_v0 }
 0x143   :  { %2392 = vmatpush3.bf16.msra.mxu0 %v3318_v30  ;;  %2412 = vmatpush3.bf16.msra.mxu1 %v3325_v31 }
 0x144   :  { %2393 = vmatprep.subr.bf16.mxu0 %v3094_v0  ;;  %2413 = vmatprep.subr.bf16.mxu1 %v3094_v0 }
 0x147   :  { %2394 = vmatpush3.bf16.msra.mxu0 %v3332_v32  ;;  %2414 = vmatpush3.bf16.msra.mxu1 %v3339_v33 }
 0x148   :  { %2419 = vmatprep.subr.bf16.mxu0 %v3094_v0  ;;  %2439 = vmatprep.subr.bf16.mxu1 %v3094_v0 }
 0x14a   :  { %2396 = vmatmul.mubr.bf16.vlgmr.msra.gmra.mxu0 %v480_v49  ;;  %2416 = vmatmul.mubr.bf16.vlgmr.msra.gmra.mxu1 %v480_v49 }
 0x14b   :  { %2420 = vmatpush3.bf16.msra.mxu0 %v3117_v1  ;;  %2440 = vmatpush3.bf16.msra.mxu1 %v3122_v2 }
 0x14c   :  { %2421 = vmatprep.subr.bf16.mxu0 %v3094_v0  ;;  %2441 = vmatprep.subr.bf16.mxu1 %v3094_v0 }
 0x14d   :  { %2435 = vmatprep.mubr.msk.bf16.mxu0 %vm3095_vm0, %v3094_v0  ;;  %2455 = vmatprep.mubr.msk.bf16.mxu1 %vm3095_vm0, %v3094_v0 }
 0x14f   :  { %2422 = vmatpush3.bf16.msra.mxu0 %v3132_v3  ;;  %2442 = vmatpush3.bf16.msra.mxu1 %v3139_v4 }
 0x150   :  { %2423 = vmatprep.subr.bf16.mxu0 %v3094_v0  ;;  %2443 = vmatprep.subr.bf16.mxu1 %v3094_v0 }
 0x153   :  { %2424 = vmatpush3.bf16.msra.mxu0 %v3146_v5  ;;  %2444 = vmatpush3.bf16.msra.mxu1 %v3153_v6 }
 0x154   :  { %2425 = vmatprep.subr.bf16.mxu0 %v3094_v0  ;;  %2445 = vmatprep.subr.bf16.mxu1 %v3094_v0 }
 0x157   :  { %2426 = vmatpush3.bf16.msra.mxu0 %v3160_v7  ;;  %2446 = vmatpush3.bf16.msra.mxu1 %v3167_v8 }
 0x158   :  { %2427 = vmatprep.subr.bf16.mxu0 %v3094_v0  ;;  %2447 = vmatprep.subr.bf16.mxu1 %v3094_v0 }
 0x15b   :  { %2428 = vmatpush3.bf16.msra.mxu0 %v3174_v9  ;;  %2448 = vmatpush3.bf16.msra.mxu1 %v3181_v10 }
 0x15c   :  { %2429 = vmatprep.subr.bf16.mxu0 %v3094_v0  ;;  %2449 = vmatprep.subr.bf16.mxu1 %v3094_v0 }
 0x15f   :  { %2430 = vmatpush3.bf16.msra.mxu0 %v3188_v11  ;;  %2450 = vmatpush3.bf16.msra.mxu1 %v3195_v12 }
 0x160   :  { %2431 = vmatprep.subr.bf16.mxu0 %v3094_v0  ;;  %2451 = vmatprep.subr.bf16.mxu1 %v3094_v0 }
 0x163   :  { %2432 = vmatpush3.bf16.msra.mxu0 %v3202_v13  ;;  %2452 = vmatpush3.bf16.msra.mxu1 %v3209_v14 }
 0x164   :  { %2433 = vmatprep.subr.bf16.mxu0 %v3094_v0  ;;  %2453 = vmatprep.subr.bf16.mxu1 %v3094_v0 }
 0x167   :  { %2434 = vmatpush3.bf16.msra.mxu0 %v3216_v15  ;;  %2454 = vmatpush3.bf16.msra.mxu1 %v3223_v16 }
 0x168   :  { %2459 = vmatprep.subr.bf16.mxu0 %v3094_v0  ;;  %2479 = vmatprep.subr.bf16.mxu1 %v3094_v0 }
 0x1ea   :  { %v516_v52 = vpop.f32.mrf.mxu0  ;;  %v567_v53 = vpop.f32.mrf.mxu1 }
 0x1eb   :  { %v573_v60 = vadd.f32 %v567_v53, %v532_v54  ;;  %v522_v61 = vadd.f32 %v516_v52, %v481_v55 }
 0x1ec   :  { %v2357_v56 = vpop.f32.mrf.mxu0  ;;  %v2377_v57 = vpop.f32.mrf.mxu1 }
 0x1ed   :  { %v1939_v19 = vmul.f32 -1.442695, %v573_v60  ;;  %v1938_v34 = vmul.f32 -1.442695, %v522_v61 }
 0x1ee   :  { %v519_v58 = vpop.f32.mrf.mxu0  ;;  %v570_v59 = vpop.f32.mrf.mxu1 }
 0x1ef   :  { %2950 = vpow2.f32 %v1939_v19 }
 0x1f0   :  { %v2358_v62 = vpop.f32.mrf.mxu0  ;;  %v2378_v63 = vpop.f32.mrf.mxu1  ;;  %2952 = vpow2.f32 %v1938_v34 }
 0x1fc   :  { %v2951_v37 = vpop.eup %2950 }
 0x1fd   :  { %v2953_v38 = vpop.eup %2952  ;;  %v577_v39 = vadd.f32 1.0, %v2951_v37 }
 0x1fe   :  { %v526_v42 = vadd.f32 1.0, %v2953_v38 }
 0x1ff   :  { %2954 = vrcp.f32 %v577_v39 }
 0x200   :  { %2956 = vrcp.f32 %v526_v42 }
 0x20a   :  { %v615_v43 = vpop.f32.mrf.mxu0  ;;  %v661_v45 = vpop.f32.mrf.mxu1 }
 0x20b   :  { %v621_v46 = vadd.f32 %v615_v43, %v580_v40  ;;  %v667_v47 = vadd.f32 %v661_v45, %v626_v41  ;;  %v1942_v41 = vld [vmem:[%s4088_s0 + $0x28] sm:$0xff] }
 0x20c   :  { %v2397_v48 = vpop.f32.mrf.mxu0  ;;  %v2417_v49 = vpop.f32.mrf.mxu1  ;;  %v826_v42 = vrot.slane %v1942_v41, 4 }
 0x20d   :  { %2958 = vtanh.f32 %v621_v46  ;;  %v1940_v50 = vmul.f32 -1.442695, %v667_v47  ;;  %v2955_v55 = vpop.eup %2954  ;;  %v782_v47 = vunpack.c.l.bf16 %v1942_v41 }
 0x20e   :  { %v618_v51 = vpop.f32.mrf.mxu0  ;;  %v664_v52 = vpop.f32.mrf.mxu1  ;;  %v674_v58 = vmul.f32 %v2955_v55, %v3388_v44  ;;  %v828_v48 = vunpack.c.l.bf16 %v826_v42 }
 0x20f   :  { %2960 = vpow2.f32 %v1940_v50  ;;  %v2957_v56 = vpop.eup %2956 }
 0x210   :  { %v2398_v53 = vpop.f32.mrf.mxu0  ;;  %v2418_v54 = vpop.f32.mrf.mxu1 }
 0x21a   :  { %v2959_v57 = vpop.eup %2958 }
 0x21b   :  { %v675_v59 = vmul.f32 %v2959_v57, %v2957_v56 }
 0x21c   :  { %v2961_v60 = vpop.eup %2960 }
 0x21d   :  { %v3470_v61 = vadd.f32 %v675_v59, %v674_v58  ;;  %v671_v62 = vadd.f32 1.0, %v2961_v60 }
 0x21f   :  { %2962 = vtanh.f32 %v3470_v61 }
 0x220   :  { %2964 = vrcp.f32 %v671_v62 }
 0x22c   :  { %v2963_v63 = vpop.eup %2962 }
 0x22d   :  { %v2965_v19 = vpop.eup %2964 }
 0x22e   :  { %v678_v34 = vmul.f32 %v2965_v19, %v2963_v63 }
 0x230   :  { %v682_v35 = vpack.c.bf16 %v678_v34, %v678_v34 }
 0x232   :  { %2436 = vmatmul.mubr.bf16.vlgmr.msra.gmra.mxu0 %v682_v35  ;;  %2456 = vmatmul.mubr.bf16.vlgmr.msra.gmra.mxu1 %v682_v35 }
 0x233   :  { %2460 = vmatpush3.bf16.msra.mxu0 %v3230_v17  ;;  %2480 = vmatpush3.bf16.msra.mxu1 %v3237_v18 }
 0x234   :  { %2461 = vmatprep.subr.bf16.mxu0 %v3094_v0  ;;  %2481 = vmatprep.subr.bf16.mxu1 %v3094_v0 }
 0x235   :  { %2475 = vmatprep.mubr.msk.bf16.mxu0 %vm3095_vm0, %v3094_v0  ;;  %2495 = vmatprep.mubr.msk.bf16.mxu1 %vm3095_vm0, %v3094_v0 }
 0x237   :  { %2462 = vmatpush3.bf16.msra.mxu0 %v3244_v20  ;;  %2482 = vmatpush3.bf16.msra.mxu1 %v3251_v21 }
 0x238   :  { %2463 = vmatprep.subr.bf16.mxu0 %v3094_v0  ;;  %2483 = vmatprep.subr.bf16.mxu1 %v3094_v0 }
 0x23b   :  { %2464 = vmatpush3.bf16.msra.mxu0 %v3262_v22  ;;  %2484 = vmatpush3.bf16.msra.mxu1 %v3269_v23 }
 0x23c   :  { %2465 = vmatprep.subr.bf16.mxu0 %v3094_v0  ;;  %2485 = vmatprep.subr.bf16.mxu1 %v3094_v0 }
 0x23f   :  { %2466 = vmatpush3.bf16.msra.mxu0 %v3276_v24  ;;  %2486 = vmatpush3.bf16.msra.mxu1 %v3283_v25 }
 0x240   :  { %2467 = vmatprep.subr.bf16.mxu0 %v3094_v0  ;;  %2487 = vmatprep.subr.bf16.mxu1 %v3094_v0 }
 0x243   :  { %2468 = vmatpush3.bf16.msra.mxu0 %v3290_v26  ;;  %2488 = vmatpush3.bf16.msra.mxu1 %v3297_v27 }
 0x244   :  { %2469 = vmatprep.subr.bf16.mxu0 %v3094_v0  ;;  %2489 = vmatprep.subr.bf16.mxu1 %v3094_v0 }
 0x247   :  { %2470 = vmatpush3.bf16.msra.mxu0 %v3304_v28  ;;  %2490 = vmatpush3.bf16.msra.mxu1 %v3311_v29 }
 0x248   :  { %2471 = vmatprep.subr.bf16.mxu0 %v3094_v0  ;;  %2491 = vmatprep.subr.bf16.mxu1 %v3094_v0 }
 0x24b   :  { %2472 = vmatpush3.bf16.msra.mxu0 %v3318_v30  ;;  %2492 = vmatpush3.bf16.msra.mxu1 %v3325_v31 }
 0x24c   :  { %2473 = vmatprep.subr.bf16.mxu0 %v3094_v0  ;;  %2493 = vmatprep.subr.bf16.mxu1 %v3094_v0 }
 0x24f   :  { %2474 = vmatpush3.bf16.msra.mxu0 %v3332_v32  ;;  %2494 = vmatpush3.bf16.msra.mxu1 %v3339_v33 }
 0x250   :  { %2499 = vmatprep.subr.bf16.mxu0 %v3094_v0  ;;  %2519 = vmatprep.subr.bf16.mxu1 %v3094_v0 }
 0x252   :  { %2476 = vmatmul.mubr.bf16.vlgmr.msra.gmra.mxu0 %v682_v35  ;;  %2496 = vmatmul.mubr.bf16.vlgmr.msra.gmra.mxu1 %v682_v35 }
 0x253   :  { %2500 = vmatpush3.bf16.msra.mxu0 %v3117_v1  ;;  %2520 = vmatpush3.bf16.msra.mxu1 %v3122_v2  ;;  %v1941_v1 = vld [vmem:[%s4088_s0 + $0x20] sm:$0xff] }
 0x254   :  { %2501 = vmatprep.subr.bf16.mxu0 %v3094_v0  ;;  %2521 = vmatprep.subr.bf16.mxu1 %v3094_v0  ;;  %v732_v2 = vrot.slane %v1941_v1, 4 }
 0x255   :  { %2515 = vmatprep.mubr.msk.bf16.mxu0 %vm3095_vm0, %v3094_v0  ;;  %2535 = vmatprep.mubr.msk.bf16.mxu1 %vm3095_vm0, %v3094_v0 }
 0x257   :  { %2502 = vmatpush3.bf16.msra.mxu0 %v3132_v3  ;;  %2522 = vmatpush3.bf16.msra.mxu1 %v3139_v4 }
 0x258   :  { %2503 = vmatprep.subr.bf16.mxu0 %v3094_v0  ;;  %2523 = vmatprep.subr.bf16.mxu1 %v3094_v0 }
 0x25b   :  { %2504 = vmatpush3.bf16.msra.mxu0 %v3146_v5  ;;  %2524 = vmatpush3.bf16.msra.mxu1 %v3153_v6  ;;  %v734_v5 = vunpack.c.l.bf16 %v732_v2  ;;  %v683_v6 = vunpack.c.l.bf16 %v1941_v1 }
 0x25c   :  { %2505 = vmatprep.subr.bf16.mxu0 %v3094_v0  ;;  %2525 = vmatprep.subr.bf16.mxu1 %v3094_v0 }
 0x25f   :  { %2506 = vmatpush3.bf16.msra.mxu0 %v3160_v7  ;;  %2526 = vmatpush3.bf16.msra.mxu1 %v3167_v8 }
 0x260   :  { %2507 = vmatprep.subr.bf16.mxu0 %v3094_v0  ;;  %2527 = vmatprep.subr.bf16.mxu1 %v3094_v0 }
 0x263   :  { %2508 = vmatpush3.bf16.msra.mxu0 %v3174_v9  ;;  %2528 = vmatpush3.bf16.msra.mxu1 %v3181_v10 }
 0x264   :  { %2509 = vmatprep.subr.bf16.mxu0 %v3094_v0  ;;  %2529 = vmatprep.subr.bf16.mxu1 %v3094_v0 }
 0x267   :  { %2510 = vmatpush3.bf16.msra.mxu0 %v3188_v11  ;;  %2530 = vmatpush3.bf16.msra.mxu1 %v3195_v12 }
 0x268   :  { %2511 = vmatprep.subr.bf16.mxu0 %v3094_v0  ;;  %2531 = vmatprep.subr.bf16.mxu1 %v3094_v0 }
 0x26b   :  { %2512 = vmatpush3.bf16.msra.mxu0 %v3202_v13  ;;  %2532 = vmatpush3.bf16.msra.mxu1 %v3209_v14 }
 0x26c   :  { %2513 = vmatprep.subr.bf16.mxu0 %v3094_v0  ;;  %2533 = vmatprep.subr.bf16.mxu1 %v3094_v0 }
 0x26f   :  { %2514 = vmatpush3.bf16.msra.mxu0 %v3216_v15  ;;  %2534 = vmatpush3.bf16.msra.mxu1 %v3223_v16 }
 0x270   :  { %2539 = vmatprep.subr.bf16.mxu0 %v3094_v0  ;;  %2559 = vmatprep.subr.bf16.mxu1 %v3094_v0 }
 0x2f2   :  { %v718_v3 = vpop.f32.mrf.mxu0  ;;  %v769_v4 = vpop.f32.mrf.mxu1 }
 0x2f3   :  { %v775_v44 = vadd.f32 %v769_v4, %v734_v5  ;;  %v724_v36 = vadd.f32 %v718_v3, %v683_v6 }
 0x2f4   :  { %v2437_v7 = vpop.f32.mrf.mxu0  ;;  %v2457_v8 = vpop.f32.mrf.mxu1 }
 0x2f5   :  { %v1944_v39 = vmul.f32 -1.442695, %v775_v44  ;;  %v1943_v40 = vmul.f32 -1.442695, %v724_v36  ;;  %v1947_v44 = vld [vmem:[%s4088_s0 + $0x38] sm:$0xff] }
 0x2f6   :  { %v721_v9 = vpop.f32.mrf.mxu0  ;;  %v772_v10 = vpop.f32.mrf.mxu1  ;;  %v1028_v36 = vrot.slane %v1947_v44, 4 }
 0x2f7   :  { %2966 = vpow2.f32 %v1944_v39 }
 0x2f8   :  { %v2438_v37 = vpop.f32.mrf.mxu0  ;;  %v2458_v38 = vpop.f32.mrf.mxu1  ;;  %2968 = vpow2.f32 %v1943_v40  ;;  %v984_v40 = vunpack.c.l.bf16 %v1947_v44  ;;  %v1030_v41 = vunpack.c.l.bf16 %v1028_v36  ;;  %v1951_v44 = vld [vmem:[%s4088_s0 + $0x40] sm:$0xff] }
 0x2f9   :  { %v1136_v36 = vrot.slane %v1951_v44, 4 }
 0x304   :  { %v2967_v43 = vpop.eup %2966 }
 0x305   :  { %v2969_v45 = vpop.eup %2968  ;;  %v779_v46 = vadd.f32 1.0, %v2967_v43 }
 0x306   :  { %v728_v49 = vadd.f32 1.0, %v2969_v45 }
 0x307   :  { %2970 = vrcp.f32 %v779_v46 }
 0x308   :  { %2972 = vrcp.f32 %v728_v49 }
 0x312   :  { %v817_v50 = vpop.f32.mrf.mxu0  ;;  %v863_v51 = vpop.f32.mrf.mxu1 }
 0x313   :  { %v823_v52 = vadd.f32 %v817_v50, %v782_v47  ;;  %v869_v53 = vadd.f32 %v863_v51, %v828_v48 }
 0x314   :  { %v2477_v54 = vpop.f32.mrf.mxu0  ;;  %v2497_v55 = vpop.f32.mrf.mxu1 }
 0x315   :  { %2974 = vtanh.f32 %v823_v52  ;;  %v1945_v56 = vmul.f32 -1.442695, %v869_v53  ;;  %v2971_v62 = vpop.eup %2970 }
 0x316   :  { %v820_v57 = vpop.f32.mrf.mxu0  ;;  %v866_v58 = vpop.f32.mrf.mxu1  ;;  %v876_v34 = vmul.f32 %v2971_v62, %v3470_v61 }
 0x317   :  { %2976 = vpow2.f32 %v1945_v56  ;;  %v2973_v63 = vpop.eup %2972 }
 0x318   :  { %v2478_v59 = vpop.f32.mrf.mxu0  ;;  %v2498_v60 = vpop.f32.mrf.mxu1 }
 0x322   :  { %v2975_v19 = vpop.eup %2974 }
 0x323   :  { %v877_v35 = vmul.f32 %v2975_v19, %v2973_v63 }
 0x324   :  { %v2977_v1 = vpop.eup %2976 }
 0x325   :  { %v3552_v2 = vadd.f32 %v877_v35, %v876_v34  ;;  %v873_v3 = vadd.f32 1.0, %v2977_v1 }
 0x327   :  { %2978 = vtanh.f32 %v3552_v2 }
 0x328   :  { %2980 = vrcp.f32 %v873_v3  ;;  %v3690_v3 = vld [vmem:[%s4087_s1 + $0xe8] ss:$16 sps:$4 sm:$0xff]  }
 0x334   :  { %v2979_v4 = vpop.eup %2978 }
 0x335   :  { %v2981_v5 = vpop.eup %2980 }
 0x336   :  { %v880_v6 = vmul.f32 %v2981_v5, %v2979_v4  ;;  %v3708_v4 = vld [vmem:[%s4087_s1 + $0xc8] ss:$16 sps:$4 sm:$0xff]   ;;  %v3714_v5 = vld [vmem:[%s4087_s1 + $0xcc] ss:$16 sps:$4 sm:$0xff]  }
 0x338   :  { %v884_v7 = vpack.c.bf16 %v880_v6, %v880_v6  ;;  %v3722_v6 = vld [vmem:[%s4087_s1 + $0xa8] ss:$16 sps:$4 sm:$0xff]  }
 0x33a   :  { %2516 = vmatmul.mubr.bf16.vlgmr.msra.gmra.mxu0 %v884_v7  ;;  %2536 = vmatmul.mubr.bf16.vlgmr.msra.gmra.mxu1 %v884_v7 }
 0x33b   :  { %2540 = vmatpush3.bf16.msra.mxu0 %v3230_v17  ;;  %2560 = vmatpush3.bf16.msra.mxu1 %v3237_v18  ;;  %v3594_v17 = vld [vmem:[%s4087_s1 + $0xe0] ss:$16 sps:$4 sm:$0xff]   ;;  %v3600_v18 = vld [vmem:[%s4087_s1 + $0xe4] ss:$16 sps:$4 sm:$0xff]  }
 0x33c   :  { %2541 = vmatprep.subr.bf16.mxu0 %v3094_v0  ;;  %2561 = vmatprep.subr.bf16.mxu1 %v3094_v0 }
 0x33d   :  { %2555 = vmatprep.mubr.msk.bf16.mxu0 %vm3095_vm0, %v3094_v0  ;;  %2575 = vmatprep.mubr.msk.bf16.mxu1 %vm3095_vm0, %v3094_v0 }
 0x33f   :  { %2542 = vmatpush3.bf16.msra.mxu0 %v3244_v20  ;;  %2562 = vmatpush3.bf16.msra.mxu1 %v3251_v21  ;;  %v3612_v20 = vld [vmem:[%s4087_s1 + $0xc0] ss:$16 sps:$4 sm:$0xff]   ;;  %v3618_v21 = vld [vmem:[%s4087_s1 + $0xc4] ss:$16 sps:$4 sm:$0xff]  }
 0x340   :  { %2543 = vmatprep.subr.bf16.mxu0 %v3094_v0  ;;  %2563 = vmatprep.subr.bf16.mxu1 %v3094_v0 }
 0x343   :  { %2544 = vmatpush3.bf16.msra.mxu0 %v3262_v22  ;;  %2564 = vmatpush3.bf16.msra.mxu1 %v3269_v23  ;;  %v3626_v22 = vld [vmem:[%s4087_s1 + $0xa0] ss:$16 sps:$4 sm:$0xff]   ;;  %v3632_v23 = vld [vmem:[%s4087_s1 + $0xa4] ss:$16 sps:$4 sm:$0xff]  }
 0x344   :  { %2545 = vmatprep.subr.bf16.mxu0 %v3094_v0  ;;  %2565 = vmatprep.subr.bf16.mxu1 %v3094_v0 }
 0x347   :  { %2546 = vmatpush3.bf16.msra.mxu0 %v3276_v24  ;;  %2566 = vmatpush3.bf16.msra.mxu1 %v3283_v25  ;;  %v3640_v24 = vld [vmem:[%s4087_s1 + $0x80] ss:$16 sps:$4 sm:$0xff]   ;;  %v3646_v25 = vld [vmem:[%s4087_s1 + $0x84] ss:$16 sps:$4 sm:$0xff]  }
 0x348   :  { %2547 = vmatprep.subr.bf16.mxu0 %v3094_v0  ;;  %2567 = vmatprep.subr.bf16.mxu1 %v3094_v0 }
 0x34b   :  { %2548 = vmatpush3.bf16.msra.mxu0 %v3290_v26  ;;  %2568 = vmatpush3.bf16.msra.mxu1 %v3297_v27  ;;  %v3654_v26 = vld [vmem:[%s4087_s1 + $0x60] ss:$16 sps:$4 sm:$0xff]   ;;  %v3660_v27 = vld [vmem:[%s4087_s1 + $0x64] ss:$16 sps:$4 sm:$0xff]  }
 0x34c   :  { %2549 = vmatprep.subr.bf16.mxu0 %v3094_v0  ;;  %2569 = vmatprep.subr.bf16.mxu1 %v3094_v0 }
 0x34f   :  { %2550 = vmatpush3.bf16.msra.mxu0 %v3304_v28  ;;  %2570 = vmatpush3.bf16.msra.mxu1 %v3311_v29 }
 0x350   :  { %2551 = vmatprep.subr.bf16.mxu0 %v3094_v0  ;;  %2571 = vmatprep.subr.bf16.mxu1 %v3094_v0 }
 0x353   :  { %2552 = vmatpush3.bf16.msra.mxu0 %v3318_v30  ;;  %2572 = vmatpush3.bf16.msra.mxu1 %v3325_v31 }
 0x354   :  { %2553 = vmatprep.subr.bf16.mxu0 %v3094_v0  ;;  %2573 = vmatprep.subr.bf16.mxu1 %v3094_v0 }
 0x357   :  { %2554 = vmatpush3.bf16.msra.mxu0 %v3332_v32  ;;  %2574 = vmatpush3.bf16.msra.mxu1 %v3339_v33 }
 0x358   :  { %2579 = vmatprep.subr.bf16.mxu0 %v3094_v0  ;;  %2599 = vmatprep.subr.bf16.mxu1 %v3094_v0 }
 0x35a   :  { %2556 = vmatmul.mubr.bf16.vlgmr.msra.gmra.mxu0 %v884_v7  ;;  %2576 = vmatmul.mubr.bf16.vlgmr.msra.gmra.mxu1 %v884_v7  ;;  %v3728_v7 = vld [vmem:[%s4087_s1 + $0xac] ss:$16 sps:$4 sm:$0xff]  }
 0x35b   :  { %2580 = vmatpush3.bf16.msra.mxu0 %v3594_v17  ;;  %2600 = vmatpush3.bf16.msra.mxu1 %v3600_v18 }
 0x35c   :  { %2581 = vmatprep.subr.bf16.mxu0 %v3094_v0  ;;  %2601 = vmatprep.subr.bf16.mxu1 %v3094_v0 }
 0x35d   :  { %2595 = vmatprep.mubr.msk.bf16.mxu0 %vm3095_vm0, %v3094_v0  ;;  %2615 = vmatprep.mubr.msk.bf16.mxu1 %vm3095_vm0, %v3094_v0 }
 0x35f   :  { %2582 = vmatpush3.bf16.msra.mxu0 %v3612_v20  ;;  %2602 = vmatpush3.bf16.msra.mxu1 %v3618_v21 }
 0x360   :  { %2583 = vmatprep.subr.bf16.mxu0 %v3094_v0  ;;  %2603 = vmatprep.subr.bf16.mxu1 %v3094_v0 }
 0x363   :  { %2584 = vmatpush3.bf16.msra.mxu0 %v3626_v22  ;;  %2604 = vmatpush3.bf16.msra.mxu1 %v3632_v23 }
 0x364   :  { %2585 = vmatprep.subr.bf16.mxu0 %v3094_v0  ;;  %2605 = vmatprep.subr.bf16.mxu1 %v3094_v0 }
 0x367   :  { %2586 = vmatpush3.bf16.msra.mxu0 %v3640_v24  ;;  %2606 = vmatpush3.bf16.msra.mxu1 %v3646_v25 }
 0x368   :  { %2587 = vmatprep.subr.bf16.mxu0 %v3094_v0  ;;  %2607 = vmatprep.subr.bf16.mxu1 %v3094_v0 }
 0x36b   :  { %2588 = vmatpush3.bf16.msra.mxu0 %v3654_v26  ;;  %2608 = vmatpush3.bf16.msra.mxu1 %v3660_v27 }
 0x36c   :  { %2589 = vmatprep.subr.bf16.mxu0 %v3094_v0  ;;  %2609 = vmatprep.subr.bf16.mxu1 %v3094_v0 }
 0x36f   :  { %2590 = vmatpush3.bf16.msra.mxu0 %v3188_v11  ;;  %2610 = vmatpush3.bf16.msra.mxu1 %v3195_v12  ;;  %v1946_v11 = vld [vmem:[%s4088_s0 + $0x30] sm:$0xff] }
 0x370   :  { %2591 = vmatprep.subr.bf16.mxu0 %v3094_v0  ;;  %2611 = vmatprep.subr.bf16.mxu1 %v3094_v0  ;;  %v934_v12 = vrot.slane %v1946_v11, 4  ;;  %v885_v29 = vunpack.c.l.bf16 %v1946_v11  ;;  %v3736_v11 = vld [vmem:[%s4087_s1 + $0x88] ss:$16 sps:$4 sm:$0xff]  }
 0x373   :  { %2592 = vmatpush3.bf16.msra.mxu0 %v3202_v13  ;;  %2612 = vmatpush3.bf16.msra.mxu1 %v3209_v14  ;;  %v936_v14 = vunpack.c.l.bf16 %v934_v12  ;;  %v3742_v12 = vld [vmem:[%s4087_s1 + $0x8c] ss:$16 sps:$4 sm:$0xff]  }
 0x374   :  { %2593 = vmatprep.subr.bf16.mxu0 %v3094_v0  ;;  %2613 = vmatprep.subr.bf16.mxu1 %v3094_v0 }
 0x377   :  { %2594 = vmatpush3.bf16.msra.mxu0 %v3216_v15  ;;  %2614 = vmatpush3.bf16.msra.mxu1 %v3223_v16 }
 0x378   :  { %2619 = vmatprep.subr.bf16.mxu0 %v3094_v0  ;;  %2639 = vmatprep.subr.bf16.mxu1 %v3094_v0 }
 0x3fa   :  { %v920_v13 = vpop.f32.mrf.mxu0  ;;  %v971_v28 = vpop.f32.mrf.mxu1 }
 0x3fb   :  { %v977_v15 = vadd.f32 %v971_v28, %v936_v14  ;;  %v926_v61 = vadd.f32 %v920_v13, %v885_v29  ;;  %v3750_v13 = vld [vmem:[%s4087_s1 + $0x68] ss:$16 sps:$4 sm:$0xff]   ;;  %v3756_v28 = vld [vmem:[%s4087_s1 + $0x6c] ss:$16 sps:$4 sm:$0xff]  }
 0x3fc   :  { %v2517_v30 = vpop.f32.mrf.mxu0  ;;  %v2537_v31 = vpop.f32.mrf.mxu1  ;;  %v3764_v14 = vld [vmem:[%s4087_s1 + $0x48] ss:$16 sps:$4 sm:$0xff]   ;;  %v3770_v29 = vld [vmem:[%s4087_s1 + $0x4c] ss:$16 sps:$4 sm:$0xff]  }
 0x3fd   :  { %v1949_v9 = vmul.f32 -1.442695, %v977_v15  ;;  %v1948_v10 = vmul.f32 -1.442695, %v926_v61  ;;  %v3778_v30 = vld [vmem:[%s4087_s1 + $0x28] ss:$16 sps:$4 sm:$0xff]  }
 0x3fe   :  { %v923_v32 = vpop.f32.mrf.mxu0  ;;  %v974_v33 = vpop.f32.mrf.mxu1  ;;  %v3784_v31 = vld [vmem:[%s4087_s1 + $0x2c] ss:$16 sps:$4 sm:$0xff]   ;;  %v3830_v15 = vld [vmem:[%s4087_s1 + $0x40] ss:$16 sps:$4 sm:$0xff]   ;;  %v3836_v61 = vld [vmem:[%s4087_s1 + $0x44] ss:$16 sps:$4 sm:$0xff]  }
 0x3ff   :  { %2982 = vpow2.f32 %v1949_v9  ;;  %v3792_v32 = vld [vmem:[%s4087_s1 + $0x8] ss:$16 sps:$4 sm:$0xff]   ;;  %v3798_v33 = vld [vmem:[%s4087_s1 + $0xc] ss:$16 sps:$4 sm:$0xff]   ;;  %v3858_v9 = vld [vmem:[%s4087_s1] ss:$16 sps:$4 sm:$0xff]  }
 0x400   :  { %v2518_v16 = vpop.f32.mrf.mxu0  ;;  %v2538_v8 = vpop.f32.mrf.mxu1  ;;  %2984 = vpow2.f32 %v1948_v10  ;;  %v3864_v10 = vld [vmem:[%s4087_s1 + $0x4] ss:$16 sps:$4 sm:$0xff]  }
 0x401   :  { %v3844_v16 = vld [vmem:[%s4087_s1 + $0x20] ss:$16 sps:$4 sm:$0xff]   ;;  %v3850_v8 = vld [vmem:[%s4087_s1 + $0x24] ss:$16 sps:$4 sm:$0xff]  }
 0x40c   :  { %v2983_v37 = vpop.eup %2982 }
 0x40d   :  { %v2985_v38 = vpop.eup %2984  ;;  %v981_v39 = vadd.f32 1.0, %v2983_v37 }
 0x40e   :  { %v930_v42 = vadd.f32 1.0, %v2985_v38 }
 0x40f   :  { %2986 = vrcp.f32 %v981_v39  ;;  %v1138_v39 = vunpack.c.l.bf16 %v1136_v36 }
 0x410   :  { %2988 = vrcp.f32 %v930_v42 }
 0x41a   :  { %v1019_v43 = vpop.f32.mrf.mxu0  ;;  %v1065_v45 = vpop.f32.mrf.mxu1 }
 0x41b   :  { %v1025_v46 = vadd.f32 %v1019_v43, %v984_v40  ;;  %v1071_v47 = vadd.f32 %v1065_v45, %v1030_v41  ;;  %v1087_v40 = vunpack.c.l.bf16 %v1951_v44 }
 0x41c   :  { %v2557_v48 = vpop.f32.mrf.mxu0  ;;  %v2577_v49 = vpop.f32.mrf.mxu1 }
 0x41d   :  { %2990 = vtanh.f32 %v1025_v46  ;;  %v1950_v50 = vmul.f32 -1.442695, %v1071_v47  ;;  %v2987_v55 = vpop.eup %2986 }
 0x41e   :  { %v1022_v51 = vpop.f32.mrf.mxu0  ;;  %v1068_v52 = vpop.f32.mrf.mxu1  ;;  %v1078_v58 = vmul.f32 %v2987_v55, %v3552_v2  ;;  %v3696_v2 = vld [vmem:[%s4087_s1 + $0xec] ss:$16 sps:$4 sm:$0xff]  }
 0x41f   :  { %2992 = vpow2.f32 %v1950_v50  ;;  %v2989_v56 = vpop.eup %2988  ;;  %v1952_v52 = vld [vmem:[%s4088_s0 + $0x48] sm:$0xff] }
 0x420   :  { %v2558_v53 = vpop.f32.mrf.mxu0  ;;  %v2578_v54 = vpop.f32.mrf.mxu1 }
 0x421   :  { %v1230_v53 = vrot.slane %v1952_v52, 4 }
 0x42a   :  { %v2991_v57 = vpop.eup %2990 }
 0x42b   :  { %v1079_v59 = vmul.f32 %v2991_v57, %v2989_v56  ;;  %v1186_v57 = vunpack.c.l.bf16 %v1952_v52 }
 0x42c   :  { %v2993_v60 = vpop.eup %2992 }
 0x42d   :  { %v3684_v62 = vadd.f32 %v1079_v59, %v1078_v58  ;;  %v1075_v63 = vadd.f32 1.0, %v2993_v60  ;;  %v1232_v58 = vunpack.c.l.bf16 %v1230_v53 }
 0x42f   :  { %2994 = vtanh.f32 %v3684_v62 }
 0x430   :  { %2996 = vrcp.f32 %v1075_v63 }
 0x43c   :  { %v2995_v19 = vpop.eup %2994 }
 0x43d   :  { %v2997_v34 = vpop.eup %2996 }
 0x43e   :  { %v1082_v35 = vmul.f32 %v2997_v34, %v2995_v19 }
 0x440   :  { %v1086_v1 = vpack.c.bf16 %v1082_v35, %v1082_v35 }
 0x442   :  { %2596 = vmatmul.mubr.bf16.vlgmr.msra.gmra.mxu0 %v1086_v1  ;;  %2616 = vmatmul.mubr.bf16.vlgmr.msra.gmra.mxu1 %v1086_v1 }
 0x443   :  { %2620 = vmatpush3.bf16.msra.mxu0 %v3690_v3  ;;  %2640 = vmatpush3.bf16.msra.mxu1 %v3696_v2 }
 0x444   :  { %2621 = vmatprep.subr.bf16.mxu0 %v3094_v0  ;;  %2641 = vmatprep.subr.bf16.mxu1 %v3094_v0 }
 0x445   :  { %2635 = vmatprep.mubr.msk.bf16.mxu0 %vm3095_vm0, %v3094_v0  ;;  %2655 = vmatprep.mubr.msk.bf16.mxu1 %vm3095_vm0, %v3094_v0 }
 0x447   :  { %2622 = vmatpush3.bf16.msra.mxu0 %v3708_v4  ;;  %2642 = vmatpush3.bf16.msra.mxu1 %v3714_v5 }
 0x448   :  { %2623 = vmatprep.subr.bf16.mxu0 %v3094_v0  ;;  %2643 = vmatprep.subr.bf16.mxu1 %v3094_v0 }
 0x44b   :  { %2624 = vmatpush3.bf16.msra.mxu0 %v3722_v6  ;;  %2644 = vmatpush3.bf16.msra.mxu1 %v3728_v7 }
 0x44c   :  { %2625 = vmatprep.subr.bf16.mxu0 %v3094_v0  ;;  %2645 = vmatprep.subr.bf16.mxu1 %v3094_v0 }
 0x44f   :  { %2626 = vmatpush3.bf16.msra.mxu0 %v3736_v11  ;;  %2646 = vmatpush3.bf16.msra.mxu1 %v3742_v12 }
 0x450   :  { %2627 = vmatprep.subr.bf16.mxu0 %v3094_v0  ;;  %2647 = vmatprep.subr.bf16.mxu1 %v3094_v0 }
 0x453   :  { %2628 = vmatpush3.bf16.msra.mxu0 %v3750_v13  ;;  %2648 = vmatpush3.bf16.msra.mxu1 %v3756_v28 }
 0x454   :  { %2629 = vmatprep.subr.bf16.mxu0 %v3094_v0  ;;  %2649 = vmatprep.subr.bf16.mxu1 %v3094_v0 }
 0x457   :  { %2630 = vmatpush3.bf16.msra.mxu0 %v3764_v14  ;;  %2650 = vmatpush3.bf16.msra.mxu1 %v3770_v29 }
 0x458   :  { %2631 = vmatprep.subr.bf16.mxu0 %v3094_v0  ;;  %2651 = vmatprep.subr.bf16.mxu1 %v3094_v0 }
 0x45b   :  { %2632 = vmatpush3.bf16.msra.mxu0 %v3778_v30  ;;  %2652 = vmatpush3.bf16.msra.mxu1 %v3784_v31 }
 0x45c   :  { %2633 = vmatprep.subr.bf16.mxu0 %v3094_v0  ;;  %2653 = vmatprep.subr.bf16.mxu1 %v3094_v0 }
 0x45f   :  { %2634 = vmatpush3.bf16.msra.mxu0 %v3792_v32  ;;  %2654 = vmatpush3.bf16.msra.mxu1 %v3798_v33 }
 0x460   :  { %2659 = vmatprep.subr.bf16.mxu0 %v3094_v0  ;;  %2679 = vmatprep.subr.bf16.mxu1 %v3094_v0 }
 0x462   :  { %2636 = vmatmul.mubr.bf16.vlgmr.msra.gmra.mxu0 %v1086_v1  ;;  %2656 = vmatmul.mubr.bf16.vlgmr.msra.gmra.mxu1 %v1086_v1 }
 0x463   :  { %2660 = vmatpush3.bf16.msra.mxu0 %v3594_v17  ;;  %2680 = vmatpush3.bf16.msra.mxu1 %v3600_v18 }
 0x464   :  { %2661 = vmatprep.subr.bf16.mxu0 %v3094_v0  ;;  %2681 = vmatprep.subr.bf16.mxu1 %v3094_v0 }
 0x465   :  { %2675 = vmatprep.mubr.msk.bf16.mxu0 %vm3095_vm0, %v3094_v0  ;;  %2695 = vmatprep.mubr.msk.bf16.mxu1 %vm3095_vm0, %v3094_v0 }
 0x467   :  { %2662 = vmatpush3.bf16.msra.mxu0 %v3612_v20  ;;  %2682 = vmatpush3.bf16.msra.mxu1 %v3618_v21 }
 0x468   :  { %2663 = vmatprep.subr.bf16.mxu0 %v3094_v0  ;;  %2683 = vmatprep.subr.bf16.mxu1 %v3094_v0 }
 0x46b   :  { %2664 = vmatpush3.bf16.msra.mxu0 %v3626_v22  ;;  %2684 = vmatpush3.bf16.msra.mxu1 %v3632_v23 }
 0x46c   :  { %2665 = vmatprep.subr.bf16.mxu0 %v3094_v0  ;;  %2685 = vmatprep.subr.bf16.mxu1 %v3094_v0 }
 0x46f   :  { %2666 = vmatpush3.bf16.msra.mxu0 %v3640_v24  ;;  %2686 = vmatpush3.bf16.msra.mxu1 %v3646_v25 }
 0x470   :  { %2667 = vmatprep.subr.bf16.mxu0 %v3094_v0  ;;  %2687 = vmatprep.subr.bf16.mxu1 %v3094_v0 }
 0x473   :  { %2668 = vmatpush3.bf16.msra.mxu0 %v3654_v26  ;;  %2688 = vmatpush3.bf16.msra.mxu1 %v3660_v27 }
 0x474   :  { %2669 = vmatprep.subr.bf16.mxu0 %v3094_v0  ;;  %2689 = vmatprep.subr.bf16.mxu1 %v3094_v0 }
 0x477   :  { %2670 = vmatpush3.bf16.msra.mxu0 %v3830_v15  ;;  %2690 = vmatpush3.bf16.msra.mxu1 %v3836_v61 }
 0x478   :  { %2671 = vmatprep.subr.bf16.mxu0 %v3094_v0  ;;  %2691 = vmatprep.subr.bf16.mxu1 %v3094_v0 }
 0x47b   :  { %2672 = vmatpush3.bf16.msra.mxu0 %v3844_v16  ;;  %2692 = vmatpush3.bf16.msra.mxu1 %v3850_v8 }
 0x47c   :  { %2673 = vmatprep.subr.bf16.mxu0 %v3094_v0  ;;  %2693 = vmatprep.subr.bf16.mxu1 %v3094_v0 }
 0x47f   :  { %2674 = vmatpush3.bf16.msra.mxu0 %v3858_v9  ;;  %2694 = vmatpush3.bf16.msra.mxu1 %v3864_v10 }
 0x480   :  { %2699 = vmatprep.subr.bf16.mxu0 %v3094_v0  ;;  %2719 = vmatprep.subr.bf16.mxu1 %v3094_v0 }
 0x502   :  { %v1122_v37 = vpop.f32.mrf.mxu0  ;;  %v1173_v38 = vpop.f32.mrf.mxu1 }
 0x503   :  { %v1179_v46 = vadd.f32 %v1173_v38, %v1138_v39  ;;  %v1128_v47 = vadd.f32 %v1122_v37, %v1087_v40 }
 0x504   :  { %v2597_v41 = vpop.f32.mrf.mxu0  ;;  %v2617_v42 = vpop.f32.mrf.mxu1 }
 0x505   :  { %v1954_v50 = vmul.f32 -1.442695, %v1179_v46  ;;  %v1953_v51 = vmul.f32 -1.442695, %v1128_v47 }
 0x506   :  { %v1125_v43 = vpop.f32.mrf.mxu0  ;;  %v1176_v45 = vpop.f32.mrf.mxu1 }
 0x507   :  { %2998 = vpow2.f32 %v1954_v50 }
 0x508   :  { %v2598_v48 = vpop.f32.mrf.mxu0  ;;  %v2618_v49 = vpop.f32.mrf.mxu1  ;;  %3000 = vpow2.f32 %v1953_v51 }
 0x514   :  { %v2999_v54 = vpop.eup %2998 }
 0x515   :  { %v3001_v55 = vpop.eup %3000  ;;  %v1183_v56 = vadd.f32 1.0, %v2999_v54 }
 0x516   :  { %v1132_v59 = vadd.f32 1.0, %v3001_v55 }
 0x517   :  { %3002 = vrcp.f32 %v1183_v56 }
 0x518   :  { %3004 = vrcp.f32 %v1132_v59 }
 0x522   :  { %v1221_v60 = vpop.f32.mrf.mxu0  ;;  %v1267_v63 = vpop.f32.mrf.mxu1 }
 0x523   :  { %v1227_v19 = vadd.f32 %v1221_v60, %v1186_v57  ;;  %v1273_v34 = vadd.f32 %v1267_v63, %v1232_v58 }
 0x524   :  { %v2637_v35 = vpop.f32.mrf.mxu0  ;;  %v2657_v1 = vpop.f32.mrf.mxu1 }
 0x525   :  { %3006 = vtanh.f32 %v1227_v19  ;;  %v1955_v44 = vmul.f32 -1.442695, %v1273_v34  ;;  %v3003_v40 = vpop.eup %3002 }
 0x526   :  { %v1224_v36 = vpop.f32.mrf.mxu0  ;;  %v1270_v37 = vpop.f32.mrf.mxu1  ;;  %v1280_v43 = vmul.f32 %v3003_v40, %v3684_v62  ;;  %v1956_v62 = vld [vmem:[%s4088_s0 + $0x50] sm:$0xff] }
 0x527   :  { %3008 = vpow2.f32 %v1955_v44  ;;  %v3005_v41 = vpop.eup %3004  ;;  %v1338_v53 = vrot.slane %v1956_v62, 4  ;;  %v1289_v57 = vunpack.c.l.bf16 %v1956_v62  ;;  %v1957_v37 = vld [vmem:[%s4088_s0 + $0x58] sm:$0xff] }
 0x528   :  { %v2638_v38 = vpop.f32.mrf.mxu0  ;;  %v2658_v39 = vpop.f32.mrf.mxu1 }
 0x529   :  { %v1340_v56 = vunpack.c.l.bf16 %v1338_v53  ;;  %v1432_v38 = vrot.slane %v1957_v37, 4 }
 0x532   :  { %v3007_v42 = vpop.eup %3006 }
 0x533   :  { %v1281_v45 = vmul.f32 %v3007_v42, %v3005_v41  ;;  %v1388_v42 = vunpack.c.l.bf16 %v1957_v37 }
 0x534   :  { %v3009_v46 = vpop.eup %3008 }
 0x535   :  { %v3876_v47 = vadd.f32 %v1281_v45, %v1280_v43  ;;  %v1277_v48 = vadd.f32 1.0, %v3009_v46  ;;  %v1434_v43 = vunpack.c.l.bf16 %v1432_v38 }
 0x537   :  { %3010 = vtanh.f32 %v3876_v47 }
 0x538   :  { %3012 = vrcp.f32 %v1277_v48 }
 0x544   :  { %v3011_v49 = vpop.eup %3010 }
 0x545   :  { %v3013_v50 = vpop.eup %3012 }
 0x546   :  { %v1284_v51 = vmul.f32 %v3013_v50, %v3011_v49 }
 0x548   :  { %v1288_v52 = vpack.c.bf16 %v1284_v51, %v1284_v51 }
 0x54a   :  { %2676 = vmatmul.mubr.bf16.vlgmr.msra.gmra.mxu0 %v1288_v52  ;;  %2696 = vmatmul.mubr.bf16.vlgmr.msra.gmra.mxu1 %v1288_v52 }
 0x54b   :  { %2700 = vmatpush3.bf16.msra.mxu0 %v3690_v3  ;;  %2720 = vmatpush3.bf16.msra.mxu1 %v3696_v2 }
 0x54c   :  { %2701 = vmatprep.subr.bf16.mxu0 %v3094_v0  ;;  %2721 = vmatprep.subr.bf16.mxu1 %v3094_v0 }
 0x54d   :  { %2715 = vmatprep.mubr.msk.bf16.mxu0 %vm3095_vm0, %v3094_v0  ;;  %2735 = vmatprep.mubr.msk.bf16.mxu1 %vm3095_vm0, %v3094_v0 }
 0x54f   :  { %2702 = vmatpush3.bf16.msra.mxu0 %v3708_v4  ;;  %2722 = vmatpush3.bf16.msra.mxu1 %v3714_v5 }
 0x550   :  { %2703 = vmatprep.subr.bf16.mxu0 %v3094_v0  ;;  %2723 = vmatprep.subr.bf16.mxu1 %v3094_v0 }
 0x553   :  { %2704 = vmatpush3.bf16.msra.mxu0 %v3722_v6  ;;  %2724 = vmatpush3.bf16.msra.mxu1 %v3728_v7 }
 0x554   :  { %2705 = vmatprep.subr.bf16.mxu0 %v3094_v0  ;;  %2725 = vmatprep.subr.bf16.mxu1 %v3094_v0 }
 0x557   :  { %2706 = vmatpush3.bf16.msra.mxu0 %v3736_v11  ;;  %2726 = vmatpush3.bf16.msra.mxu1 %v3742_v12 }
 0x558   :  { %2707 = vmatprep.subr.bf16.mxu0 %v3094_v0  ;;  %2727 = vmatprep.subr.bf16.mxu1 %v3094_v0 }
 0x55b   :  { %2708 = vmatpush3.bf16.msra.mxu0 %v3750_v13  ;;  %2728 = vmatpush3.bf16.msra.mxu1 %v3756_v28 }
 0x55c   :  { %2709 = vmatprep.subr.bf16.mxu0 %v3094_v0  ;;  %2729 = vmatprep.subr.bf16.mxu1 %v3094_v0 }
 0x55f   :  { %2710 = vmatpush3.bf16.msra.mxu0 %v3764_v14  ;;  %2730 = vmatpush3.bf16.msra.mxu1 %v3770_v29 }
 0x560   :  { %2711 = vmatprep.subr.bf16.mxu0 %v3094_v0  ;;  %2731 = vmatprep.subr.bf16.mxu1 %v3094_v0 }
 0x563   :  { %2712 = vmatpush3.bf16.msra.mxu0 %v3778_v30  ;;  %2732 = vmatpush3.bf16.msra.mxu1 %v3784_v31 }
 0x564   :  { %2713 = vmatprep.subr.bf16.mxu0 %v3094_v0  ;;  %2733 = vmatprep.subr.bf16.mxu1 %v3094_v0 }
 0x567   :  { %2714 = vmatpush3.bf16.msra.mxu0 %v3792_v32  ;;  %2734 = vmatpush3.bf16.msra.mxu1 %v3798_v33 }
 0x568   :  { %2739 = vmatprep.subr.bf16.mxu0 %v3094_v0  ;;  %2759 = vmatprep.subr.bf16.mxu1 %v3094_v0 }
 0x56a   :  { %2716 = vmatmul.mubr.bf16.vlgmr.msra.gmra.mxu0 %v1288_v52  ;;  %2736 = vmatmul.mubr.bf16.vlgmr.msra.gmra.mxu1 %v1288_v52 }
 0x56b   :  { %2740 = vmatpush3.bf16.msra.mxu0 %v3594_v17  ;;  %2760 = vmatpush3.bf16.msra.mxu1 %v3600_v18 }
 0x56c   :  { %2741 = vmatprep.subr.bf16.mxu0 %v3094_v0  ;;  %2761 = vmatprep.subr.bf16.mxu1 %v3094_v0 }
 0x56d   :  { %2755 = vmatprep.mubr.msk.bf16.mxu0 %vm3095_vm0, %v3094_v0  ;;  %2775 = vmatprep.mubr.msk.bf16.mxu1 %vm3095_vm0, %v3094_v0 }
 0x56f   :  { %2742 = vmatpush3.bf16.msra.mxu0 %v3612_v20  ;;  %2762 = vmatpush3.bf16.msra.mxu1 %v3618_v21 }
 0x570   :  { %2743 = vmatprep.subr.bf16.mxu0 %v3094_v0  ;;  %2763 = vmatprep.subr.bf16.mxu1 %v3094_v0 }
 0x573   :  { %2744 = vmatpush3.bf16.msra.mxu0 %v3626_v22  ;;  %2764 = vmatpush3.bf16.msra.mxu1 %v3632_v23 }
 0x574   :  { %2745 = vmatprep.subr.bf16.mxu0 %v3094_v0  ;;  %2765 = vmatprep.subr.bf16.mxu1 %v3094_v0 }
 0x577   :  { %2746 = vmatpush3.bf16.msra.mxu0 %v3640_v24  ;;  %2766 = vmatpush3.bf16.msra.mxu1 %v3646_v25 }
 0x578   :  { %2747 = vmatprep.subr.bf16.mxu0 %v3094_v0  ;;  %2767 = vmatprep.subr.bf16.mxu1 %v3094_v0 }
 0x57b   :  { %2748 = vmatpush3.bf16.msra.mxu0 %v3654_v26  ;;  %2768 = vmatpush3.bf16.msra.mxu1 %v3660_v27 }
 0x57c   :  { %2749 = vmatprep.subr.bf16.mxu0 %v3094_v0  ;;  %2769 = vmatprep.subr.bf16.mxu1 %v3094_v0 }
 0x57f   :  { %2750 = vmatpush3.bf16.msra.mxu0 %v3830_v15  ;;  %2770 = vmatpush3.bf16.msra.mxu1 %v3836_v61 }
 0x580   :  { %2751 = vmatprep.subr.bf16.mxu0 %v3094_v0  ;;  %2771 = vmatprep.subr.bf16.mxu1 %v3094_v0 }
 0x583   :  { %2752 = vmatpush3.bf16.msra.mxu0 %v3844_v16  ;;  %2772 = vmatpush3.bf16.msra.mxu1 %v3850_v8 }
 0x584   :  { %2753 = vmatprep.subr.bf16.mxu0 %v3094_v0  ;;  %2773 = vmatprep.subr.bf16.mxu1 %v3094_v0 }
 0x587   :  { %2754 = vmatpush3.bf16.msra.mxu0 %v3858_v9  ;;  %2774 = vmatpush3.bf16.msra.mxu1 %v3864_v10 }
 0x588   :  { %2779 = vmatprep.subr.bf16.mxu0 %v3094_v0  ;;  %2799 = vmatprep.subr.bf16.mxu1 %v3094_v0 }
 0x60a   :  { %v1324_v54 = vpop.f32.mrf.mxu0  ;;  %v1375_v55 = vpop.f32.mrf.mxu1 }
 0x60b   :  { %v1381_v19 = vadd.f32 %v1375_v55, %v1340_v56  ;;  %v1330_v34 = vadd.f32 %v1324_v54, %v1289_v57 }
 0x60c   :  { %v2677_v58 = vpop.f32.mrf.mxu0  ;;  %v2697_v59 = vpop.f32.mrf.mxu1 }
 0x60d   :  { %v1959_v44 = vmul.f32 -1.442695, %v1381_v19  ;;  %v1958_v36 = vmul.f32 -1.442695, %v1330_v34 }
 0x60e   :  { %v1327_v60 = vpop.f32.mrf.mxu0  ;;  %v1378_v63 = vpop.f32.mrf.mxu1 }
 0x60f   :  { %3014 = vpow2.f32 %v1959_v44 }
 0x610   :  { %v2678_v35 = vpop.f32.mrf.mxu0  ;;  %v2698_v1 = vpop.f32.mrf.mxu1  ;;  %3016 = vpow2.f32 %v1958_v36 }
 0x61c   :  { %v3015_v39 = vpop.eup %3014 }
 0x61d   :  { %v3017_v40 = vpop.eup %3016  ;;  %v1385_v41 = vadd.f32 1.0, %v3015_v39 }
 0x61e   :  { %v1334_v45 = vadd.f32 1.0, %v3017_v40 }
 0x61f   :  { %3018 = vrcp.f32 %v1385_v41 }
 0x620   :  { %3020 = vrcp.f32 %v1334_v45 }
 0x62a   :  { %v1423_v46 = vpop.f32.mrf.mxu0  ;;  %v1469_v48 = vpop.f32.mrf.mxu1 }
 0x62b   :  { %v1429_v49 = vadd.f32 %v1423_v46, %v1388_v42  ;;  %v1475_v50 = vadd.f32 %v1469_v48, %v1434_v43 }
 0x62c   :  { %v2717_v51 = vpop.f32.mrf.mxu0  ;;  %v2737_v52 = vpop.f32.mrf.mxu1 }
 0x62d   :  { %3022 = vtanh.f32 %v1429_v49  ;;  %v1960_v62 = vmul.f32 -1.442695, %v1475_v50  ;;  %v3019_v57 = vpop.eup %3018 }
 0x62e   :  { %v1426_v53 = vpop.f32.mrf.mxu0  ;;  %v1472_v54 = vpop.f32.mrf.mxu1  ;;  %v1482_v60 = vmul.f32 %v3019_v57, %v3876_v47  ;;  %v1962_v47 = vld [vmem:[%s4088_s0 + $0x68] sm:$0xff] }
 0x62f   :  { %3024 = vpow2.f32 %v1960_v62  ;;  %v3021_v58 = vpop.eup %3020  ;;  %v1634_v38 = vrot.slane %v1962_v47, 4  ;;  %v1590_v42 = vunpack.c.l.bf16 %v1962_v47 }
 0x630   :  { %v2718_v55 = vpop.f32.mrf.mxu0  ;;  %v2738_v56 = vpop.f32.mrf.mxu1 }
 0x631   :  { %v1636_v43 = vunpack.c.l.bf16 %v1634_v38 }
 0x63a   :  { %v3023_v59 = vpop.eup %3022 }
 0x63b   :  { %v1483_v63 = vmul.f32 %v3023_v59, %v3021_v58 }
 0x63c   :  { %v3025_v19 = vpop.eup %3024 }
 0x63d   :  { %v3958_v34 = vadd.f32 %v1483_v63, %v1482_v60  ;;  %v1479_v35 = vadd.f32 1.0, %v3025_v19 }
 0x63f   :  { %3026 = vtanh.f32 %v3958_v34 }
 0x640   :  { %3028 = vrcp.f32 %v1479_v35 }
 0x64c   :  { %v3027_v1 = vpop.eup %3026 }
 0x64d   :  { %v3029_v44 = vpop.eup %3028 }
 0x64e   :  { %v1486_v36 = vmul.f32 %v3029_v44, %v3027_v1 }
 0x650   :  { %v1490_v37 = vpack.c.bf16 %v1486_v36, %v1486_v36 }
 0x652   :  { %2756 = vmatmul.mubr.bf16.vlgmr.msra.gmra.mxu0 %v1490_v37  ;;  %2776 = vmatmul.mubr.bf16.vlgmr.msra.gmra.mxu1 %v1490_v37 }
 0x653   :  { %2780 = vmatpush3.bf16.msra.mxu0 %v3690_v3  ;;  %2800 = vmatpush3.bf16.msra.mxu1 %v3696_v2 }
 0x654   :  { %2781 = vmatprep.subr.bf16.mxu0 %v3094_v0  ;;  %2801 = vmatprep.subr.bf16.mxu1 %v3094_v0 }
 0x655   :  { %2795 = vmatprep.mubr.msk.bf16.mxu0 %vm3095_vm0, %v3094_v0  ;;  %2815 = vmatprep.mubr.msk.bf16.mxu1 %vm3095_vm0, %v3094_v0 }
 0x657   :  { %2782 = vmatpush3.bf16.msra.mxu0 %v3708_v4  ;;  %2802 = vmatpush3.bf16.msra.mxu1 %v3714_v5 }
 0x658   :  { %2783 = vmatprep.subr.bf16.mxu0 %v3094_v0  ;;  %2803 = vmatprep.subr.bf16.mxu1 %v3094_v0 }
 0x65b   :  { %2784 = vmatpush3.bf16.msra.mxu0 %v3722_v6  ;;  %2804 = vmatpush3.bf16.msra.mxu1 %v3728_v7 }
 0x65c   :  { %2785 = vmatprep.subr.bf16.mxu0 %v3094_v0  ;;  %2805 = vmatprep.subr.bf16.mxu1 %v3094_v0 }
 0x65f   :  { %2786 = vmatpush3.bf16.msra.mxu0 %v3736_v11  ;;  %2806 = vmatpush3.bf16.msra.mxu1 %v3742_v12 }
 0x660   :  { %2787 = vmatprep.subr.bf16.mxu0 %v3094_v0  ;;  %2807 = vmatprep.subr.bf16.mxu1 %v3094_v0 }
 0x663   :  { %2788 = vmatpush3.bf16.msra.mxu0 %v3750_v13  ;;  %2808 = vmatpush3.bf16.msra.mxu1 %v3756_v28 }
 0x664   :  { %2789 = vmatprep.subr.bf16.mxu0 %v3094_v0  ;;  %2809 = vmatprep.subr.bf16.mxu1 %v3094_v0 }
 0x667   :  { %2790 = vmatpush3.bf16.msra.mxu0 %v3764_v14  ;;  %2810 = vmatpush3.bf16.msra.mxu1 %v3770_v29 }
 0x668   :  { %2791 = vmatprep.subr.bf16.mxu0 %v3094_v0  ;;  %2811 = vmatprep.subr.bf16.mxu1 %v3094_v0 }
 0x66b   :  { %2792 = vmatpush3.bf16.msra.mxu0 %v3778_v30  ;;  %2812 = vmatpush3.bf16.msra.mxu1 %v3784_v31 }
 0x66c   :  { %2793 = vmatprep.subr.bf16.mxu0 %v3094_v0  ;;  %2813 = vmatprep.subr.bf16.mxu1 %v3094_v0 }
 0x66f   :  { %2794 = vmatpush3.bf16.msra.mxu0 %v3792_v32  ;;  %2814 = vmatpush3.bf16.msra.mxu1 %v3798_v33 }
 0x670   :  { %2819 = vmatprep.subr.bf16.mxu0 %v3094_v0  ;;  %2839 = vmatprep.subr.bf16.mxu1 %v3094_v0 }
 0x672   :  { %2796 = vmatmul.mubr.bf16.vlgmr.msra.gmra.mxu0 %v1490_v37  ;;  %2816 = vmatmul.mubr.bf16.vlgmr.msra.gmra.mxu1 %v1490_v37 }
 0x673   :  { %2820 = vmatpush3.bf16.msra.mxu0 %v3594_v17  ;;  %2840 = vmatpush3.bf16.msra.mxu1 %v3600_v18  ;;  %v1961_v17 = vld [vmem:[%s4088_s0 + $0x60] sm:$0xff] }
 0x674   :  { %2821 = vmatprep.subr.bf16.mxu0 %v3094_v0  ;;  %2841 = vmatprep.subr.bf16.mxu1 %v3094_v0  ;;  %v1540_v18 = vrot.slane %v1961_v17, 4 }
 0x675   :  { %2835 = vmatprep.mubr.msk.bf16.mxu0 %vm3095_vm0, %v3094_v0  ;;  %2855 = vmatprep.mubr.msk.bf16.mxu1 %vm3095_vm0, %v3094_v0 }
 0x677   :  { %2822 = vmatpush3.bf16.msra.mxu0 %v3612_v20  ;;  %2842 = vmatpush3.bf16.msra.mxu1 %v3618_v21 }
 0x678   :  { %2823 = vmatprep.subr.bf16.mxu0 %v3094_v0  ;;  %2843 = vmatprep.subr.bf16.mxu1 %v3094_v0 }
 0x67b   :  { %2824 = vmatpush3.bf16.msra.mxu0 %v3626_v22  ;;  %2844 = vmatpush3.bf16.msra.mxu1 %v3632_v23  ;;  %v1542_v22 = vunpack.c.l.bf16 %v1540_v18  ;;  %v1491_v23 = vunpack.c.l.bf16 %v1961_v17 }
 0x67c   :  { %2825 = vmatprep.subr.bf16.mxu0 %v3094_v0  ;;  %2845 = vmatprep.subr.bf16.mxu1 %v3094_v0 }
 0x67f   :  { %2826 = vmatpush3.bf16.msra.mxu0 %v3640_v24  ;;  %2846 = vmatpush3.bf16.msra.mxu1 %v3646_v25 }
 0x680   :  { %2827 = vmatprep.subr.bf16.mxu0 %v3094_v0  ;;  %2847 = vmatprep.subr.bf16.mxu1 %v3094_v0 }
 0x683   :  { %2828 = vmatpush3.bf16.msra.mxu0 %v3654_v26  ;;  %2848 = vmatpush3.bf16.msra.mxu1 %v3660_v27 }
 0x684   :  { %2829 = vmatprep.subr.bf16.mxu0 %v3094_v0  ;;  %2849 = vmatprep.subr.bf16.mxu1 %v3094_v0 }
 0x687   :  { %2830 = vmatpush3.bf16.msra.mxu0 %v3830_v15  ;;  %2850 = vmatpush3.bf16.msra.mxu1 %v3836_v61 }
 0x688   :  { %2831 = vmatprep.subr.bf16.mxu0 %v3094_v0  ;;  %2851 = vmatprep.subr.bf16.mxu1 %v3094_v0 }
 0x68b   :  { %2832 = vmatpush3.bf16.msra.mxu0 %v3844_v16  ;;  %2852 = vmatpush3.bf16.msra.mxu1 %v3850_v8 }
 0x68c   :  { %2833 = vmatprep.subr.bf16.mxu0 %v3094_v0  ;;  %2853 = vmatprep.subr.bf16.mxu1 %v3094_v0 }
 0x68f   :  { %2834 = vmatpush3.bf16.msra.mxu0 %v3858_v9  ;;  %2854 = vmatpush3.bf16.msra.mxu1 %v3864_v10 }
 0x690   :  { %2859 = vmatprep.subr.bf16.mxu0 %v3094_v0  ;;  %2879 = vmatprep.subr.bf16.mxu1 %v3094_v0 }
 0x712   :  { %v1526_v20 = vpop.f32.mrf.mxu0  ;;  %v1577_v21 = vpop.f32.mrf.mxu1 }
 0x713   :  { %v1583_v15 = vadd.f32 %v1577_v21, %v1542_v22  ;;  %v1532_v61 = vadd.f32 %v1526_v20, %v1491_v23 }
 0x714   :  { %v2757_v24 = vpop.f32.mrf.mxu0  ;;  %v2777_v25 = vpop.f32.mrf.mxu1 }
 0x715   :  { %v1964_v9 = vmul.f32 -1.442695, %v1583_v15  ;;  %v1963_v10 = vmul.f32 -1.442695, %v1532_v61 }
 0x716   :  { %v1529_v26 = vpop.f32.mrf.mxu0  ;;  %v1580_v27 = vpop.f32.mrf.mxu1 }
 0x717   :  { %3030 = vpow2.f32 %v1964_v9 }
 0x718   :  { %v2758_v16 = vpop.f32.mrf.mxu0  ;;  %v2778_v8 = vpop.f32.mrf.mxu1  ;;  %3032 = vpow2.f32 %v1963_v10 }
 0x724   :  { %v3031_v39 = vpop.eup %3030 }
 0x725   :  { %v3033_v40 = vpop.eup %3032  ;;  %v1587_v41 = vadd.f32 1.0, %v3031_v39 }
 0x726   :  { %v1536_v45 = vadd.f32 1.0, %v3033_v40 }
 0x727   :  { %3034 = vrcp.f32 %v1587_v41 }
 0x728   :  { %3036 = vrcp.f32 %v1536_v45 }
 0x732   :  { %v1625_v46 = vpop.f32.mrf.mxu0  ;;  %v1671_v48 = vpop.f32.mrf.mxu1 }
 0x733   :  { %v1631_v49 = vadd.f32 %v1625_v46, %v1590_v42  ;;  %v1677_v50 = vadd.f32 %v1671_v48, %v1636_v43 }
 0x734   :  { %v2797_v51 = vpop.f32.mrf.mxu0  ;;  %v2817_v52 = vpop.f32.mrf.mxu1 }
 0x735   :  { %3038 = vtanh.f32 %v1631_v49  ;;  %v1965_v62 = vmul.f32 -1.442695, %v1677_v50  ;;  %v3035_v57 = vpop.eup %3034 }
 0x736   :  { %v1628_v53 = vpop.f32.mrf.mxu0  ;;  %v1674_v54 = vpop.f32.mrf.mxu1  ;;  %v1684_v60 = vmul.f32 %v3035_v57, %v3958_v34 }
 0x737   :  { %3040 = vpow2.f32 %v1965_v62  ;;  %v3037_v58 = vpop.eup %3036 }
 0x738   :  { %v2798_v55 = vpop.f32.mrf.mxu0  ;;  %v2818_v56 = vpop.f32.mrf.mxu1 }
 0x742   :  { %v3039_v59 = vpop.eup %3038 }
 0x743   :  { %v1685_v63 = vmul.f32 %v3039_v59, %v3037_v58 }
 0x744   :  { %v3041_v19 = vpop.eup %3040 }
 0x745   :  { %v4040_v35 = vadd.f32 %v1685_v63, %v1684_v60  ;;  %v1681_v1 = vadd.f32 1.0, %v3041_v19 }
 0x747   :  { %3042 = vtanh.f32 %v4040_v35 }
 0x748   :  { %3044 = vrcp.f32 %v1681_v1 }
 0x754   :  { %v3043_v44 = vpop.eup %3042 }
 0x755   :  { %v3045_v36 = vpop.eup %3044 }
 0x756   :  { %v1688_v37 = vmul.f32 %v3045_v36, %v3043_v44 }
 0x758   :  { %v1692_v17 = vpack.c.bf16 %v1688_v37, %v1688_v37 }
 0x75a   :  { %2836 = vmatmul.mubr.bf16.vlgmr.msra.gmra.mxu0 %v1692_v17  ;;  %2856 = vmatmul.mubr.bf16.vlgmr.msra.gmra.mxu1 %v1692_v17 }
 0x75b   :  { %2860 = vmatpush3.bf16.msra.mxu0 %v3690_v3  ;;  %2880 = vmatpush3.bf16.msra.mxu1 %v3696_v2  ;;  %v1966_v3 = vld [vmem:[%s4088_s0 + $0x70] sm:$0xff] }
 0x75c   :  { %2861 = vmatprep.subr.bf16.mxu0 %v3094_v0  ;;  %2881 = vmatprep.subr.bf16.mxu1 %v3094_v0  ;;  %v1742_v2 = vrot.slane %v1966_v3, 4 }
 0x75d   :  { %2875 = vmatprep.mubr.msk.bf16.mxu0 %vm3095_vm0, %v3094_v0  ;;  %2895 = vmatprep.mubr.msk.bf16.mxu1 %vm3095_vm0, %v3094_v0 }
 0x75f   :  { %2862 = vmatpush3.bf16.msra.mxu0 %v3708_v4  ;;  %2882 = vmatpush3.bf16.msra.mxu1 %v3714_v5 }
 0x760   :  { %2863 = vmatprep.subr.bf16.mxu0 %v3094_v0  ;;  %2883 = vmatprep.subr.bf16.mxu1 %v3094_v0 }
 0x763   :  { %2864 = vmatpush3.bf16.msra.mxu0 %v3722_v6  ;;  %2884 = vmatpush3.bf16.msra.mxu1 %v3728_v7  ;;  %v1744_v6 = vunpack.c.l.bf16 %v1742_v2  ;;  %v1693_v7 = vunpack.c.l.bf16 %v1966_v3 }
 0x764   :  { %2865 = vmatprep.subr.bf16.mxu0 %v3094_v0  ;;  %2885 = vmatprep.subr.bf16.mxu1 %v3094_v0 }
 0x767   :  { %2866 = vmatpush3.bf16.msra.mxu0 %v3736_v11  ;;  %2886 = vmatpush3.bf16.msra.mxu1 %v3742_v12 }
 0x768   :  { %2867 = vmatprep.subr.bf16.mxu0 %v3094_v0  ;;  %2887 = vmatprep.subr.bf16.mxu1 %v3094_v0 }
 0x76b   :  { %2868 = vmatpush3.bf16.msra.mxu0 %v3750_v13  ;;  %2888 = vmatpush3.bf16.msra.mxu1 %v3756_v28 }
 0x76c   :  { %2869 = vmatprep.subr.bf16.mxu0 %v3094_v0  ;;  %2889 = vmatprep.subr.bf16.mxu1 %v3094_v0 }
 0x76f   :  { %2870 = vmatpush3.bf16.msra.mxu0 %v3764_v14  ;;  %2890 = vmatpush3.bf16.msra.mxu1 %v3770_v29 }
 0x770   :  { %2871 = vmatprep.subr.bf16.mxu0 %v3094_v0  ;;  %2891 = vmatprep.subr.bf16.mxu1 %v3094_v0 }
 0x773   :  { %2872 = vmatpush3.bf16.msra.mxu0 %v3778_v30  ;;  %2892 = vmatpush3.bf16.msra.mxu1 %v3784_v31 }
 0x774   :  { %2873 = vmatprep.subr.bf16.mxu0 %v3094_v0  ;;  %2893 = vmatprep.subr.bf16.mxu1 %v3094_v0 }
 0x777   :  { %2874 = vmatpush3.bf16.msra.mxu0 %v3792_v32  ;;  %2894 = vmatpush3.bf16.msra.mxu1 %v3798_v33  ;;  %v1967_v33 = vld [vmem:[%s4088_s0 + $0x78] sm:$0xff] }
 0x778   :  { %v1836_v34 = vrot.slane %v1967_v33, 4  ;;  %v1792_v22 = vunpack.c.l.bf16 %v1967_v33 }
 0x77a   :  { %2876 = vmatmul.mubr.bf16.vlgmr.msra.gmra.mxu0 %v1692_v17  ;;  %2896 = vmatmul.mubr.bf16.vlgmr.msra.gmra.mxu1 %v1692_v17  ;;  %v1838_v23 = vunpack.c.l.bf16 %v1836_v34 }
 0x81a   :  { %v1728_v4 = vpop.f32.mrf.mxu0  ;;  %v1779_v5 = vpop.f32.mrf.mxu1 }
 0x81b   :  { %v1785_v0 = vadd.f32 %v1779_v5, %v1744_v6  ;;  %v1734_v14 = vadd.f32 %v1728_v4, %v1693_v7 }
 0x81c   :  { %v2837_v11 = vpop.f32.mrf.mxu0  ;;  %v2857_v12 = vpop.f32.mrf.mxu1 }
 0x81d   :  { %v1969_v31 = vmul.f32 -1.442695, %v1785_v0  ;;  %v1968_v32 = vmul.f32 -1.442695, %v1734_v14 }
 0x81e   :  { %v1731_v13 = vpop.f32.mrf.mxu0  ;;  %v1782_v28 = vpop.f32.mrf.mxu1 }
 0x81f   :  { %3046 = vpow2.f32 %v1969_v31 }
 0x820   :  { %v2838_v29 = vpop.f32.mrf.mxu0  ;;  %v2858_v30 = vpop.f32.mrf.mxu1  ;;  %3048 = vpow2.f32 %v1968_v32 }
 0x82c   :  { %v3047_v18 = vpop.eup %3046 }
 0x82d   :  { %v3049_v20 = vpop.eup %3048  ;;  %v1789_v21 = vadd.f32 1.0, %v3047_v18 }
 0x82e   :  { %v1738_v24 = vadd.f32 1.0, %v3049_v20 }
 0x82f   :  { %3050 = vrcp.f32 %v1789_v21 }
 0x830   :  { %3052 = vrcp.f32 %v1738_v24 }
 0x83a   :  { %v1827_v25 = vpop.f32.mrf.mxu0  ;;  %v1873_v26 = vpop.f32.mrf.mxu1 }
 0x83b   :  { %v1833_v27 = vadd.f32 %v1827_v25, %v1792_v22  ;;  %v1879_v15 = vadd.f32 %v1873_v26, %v1838_v23 }
 0x83c   :  { %v2877_v61 = vpop.f32.mrf.mxu0  ;;  %v2897_v16 = vpop.f32.mrf.mxu1 }
 0x83d   :  { %3054 = vtanh.f32 %v1833_v27  ;;  %v1970_v8 = vmul.f32 -1.442695, %v1879_v15  ;;  %v3051_v39 = vpop.eup %3050 }
 0x83e   :  { %v1830_v9 = vpop.f32.mrf.mxu0  ;;  %v1876_v10 = vpop.f32.mrf.mxu1  ;;  %v1886_v42 = vmul.f32 %v3051_v39, %v4040_v35 }
 0x83f   :  { %3056 = vpow2.f32 %v1970_v8  ;;  %v3053_v40 = vpop.eup %3052 }
 0x840   :  { %v2878_v47 = vpop.f32.mrf.mxu0  ;;  %v2898_v38 = vpop.f32.mrf.mxu1 }
 0x84a   :  { %v3055_v41 = vpop.eup %3054 }
 0x84b   :  { %v1887_v43 = vmul.f32 %v3055_v41, %v3053_v40 }
 0x84c   :  { %v3057_v45 = vpop.eup %3056 }
 0x84d   :  { %v1888_v46 = vadd.f32 %v1887_v43, %v1886_v42  ;;  %v1883_v48 = vadd.f32 1.0, %v3057_v45 }
 0x84f   :  { %3058 = vtanh.f32 %v1888_v46 }
 0x850   :  { %3060 = vrcp.f32 %v1883_v48 }
 0x85c   :  { %v3059_v49 = vpop.eup %3058 }
 0x85d   :  { %v3061_v50 = vpop.eup %3060 }
 0x85e   :  { %v1890_v51 = vmul.f32 %v3061_v50, %v3059_v49 }
 0x860   :  { %1896 = vst [vmem:[%s4089_s2] sm:$0xff] %v1890_v51 }

</bundles_post_ra>
